<compile_context>
chip_gen: v7x
topology: tpu7x:2x2x1
jax: 0.10.0
libtpu: 0.0.40
codegen_flags: <defaults>
</compile_context>

<pallas_src>
import jax
import jax.numpy as jnp
from jax.experimental import pallas as pl
from jax.experimental.pallas import tpu as pltpu

# Autoencoder layer sizes (encoder then decoder), matching the PyTorch module.
LAYER_DIMS = [28 * 28, 128, 64, 36, 18, 9, 18, 36, 64, 128, 28 * 28]
# ReLU follows every linear except the encoder's last (18->9) and the decoder's
# last (128->784).
RELU_AFTER = [True, True, True, True, False, True, True, True, True, False]

D_IN = 28 * 28  # 784 — input/output feature dim, kept unpadded (6*128 + masked tail)


def _pad_dim(d):
    return ((d + 127) // 128) * 128


# Interior hidden dims padded to lane multiples (all become 128); ends stay 784.
PAD_DIMS = [LAYER_DIMS[0]] + [_pad_dim(d) for d in LAYER_DIMS[1:-1]] + [LAYER_DIMS[-1]]


def _choose_tb(batch):
    """Pick the batch tile: biggest in {512..8}, preferring an even grid >= 2.

    Even grid length keeps the two v7x TensorCores balanced under
    dimension_semantics=("parallel",); per-step overhead (~0.35us) favors big tiles.
    """
    candidates = (512, 256, 128, 64, 32, 16, 8)
    for tb in candidates:
        steps = -(-batch // tb)
        if steps >= 2 and steps % 2 == 0:
            return tb
    for tb in candidates:
        if -(-batch // tb) >= 2:
            return tb
    # Tiny batch: single grid step; use the full batch as the block (legal since the
    # block dim equals the full array dim) when it isn't a multiple of 8.
    return batch if batch < 8 else 8


def ae_kernel(x_ref, *refs):
    """Full MLP autoencoder forward on one (TB, 784) batch tile.

    refs = (w0, b0, w1, b1, ..., w9, b9, out_ref)
    Weights bf16, biases f32; matmuls accumulate in f32; x cast to bf16 in-kernel.
    """
    out_ref = refs[-1]
    param_refs = refs[:-1]
    n_layers = len(param_refs) // 2

    h = x_ref[...].astype(jnp.bfloat16)  # in-kernel f32 -> bf16 cast (VPU, DMA-hidden)
    for li in range(n_layers):
        w = param_refs[2 * li][...]        # (in_pad, out_pad) bf16
        b = param_refs[2 * li + 1][...]    # (1, out_pad)      f32
        acc = jnp.dot(h, w, preferred_element_type=jnp.float32) + b
        if RELU_AFTER[li]:
            acc = jnp.maximum(acc, 0.0)
        if li < n_layers - 1:
            h = acc.astype(jnp.bfloat16)   # bf16 MXU input for the next layer
        else:
            h = acc                        # keep final f32 accumulator
    out_ref[...] = h.astype(out_ref.dtype)


def prepare_params(params):
    """Cast weights to bf16 / biases to f32 and zero-pad hidden dims to PAD_DIMS.

    Zero rows/cols in the weights and zero bias entries make the padding exact
    (padded activation lanes stay identically zero through ReLU).
    Returns a flat list [w0, b0, ..., w9, b9] ready for ae_forward.
    """
    flat = []
    for li, (w, b) in enumerate(params):
        in_d, out_d = LAYER_DIMS[li], LAYER_DIMS[li + 1]
        pin, pout = PAD_DIMS[li], PAD_DIMS[li + 1]
        w = jnp.pad(w.astype(jnp.bfloat16), ((0, pin - in_d), (0, pout - out_d)))
        b = jnp.pad(b.astype(jnp.float32).reshape(1, -1), ((0, 0), (0, pout - out_d)))
        flat.extend([w, b])
    return flat


@jax.jit
def ae_forward(x, flat_params):
    B, D = x.shape
    assert D == D_IN

    tb = _choose_tb(B)
    grid = (-(-B // tb),)  # ragged last block (if any) is masked by Pallas

    # x stays f32 and unpadded in HBM; block last dim == full array dim (784).
    in_specs = [pl.BlockSpec((tb, D_IN), lambda i: (i, 0))]
    for p in flat_params:
        # Constant block index -> params resident in VMEM across all grid steps.
        in_specs.append(pl.BlockSpec(p.shape, lambda i: (0, 0)))
    out_spec = pl.BlockSpec((tb, D_IN), lambda i: (i, 0))

    flops = 2 * B * sum(
        PAD_DIMS[i] * PAD_DIMS[i + 1] for i in range(len(PAD_DIMS) - 1)
    )
    bytes_accessed = (
        int(x.size) * x.dtype.itemsize                # f32 input, read once
        + B * D_IN * 2                                # bf16 output
        + sum(int(p.size) * p.dtype.itemsize for p in flat_params)
    )

    out = pl.pallas_call(
        ae_kernel,
        out_shape=jax.ShapeDtypeStruct((B, D_IN), jnp.bfloat16),
        grid_spec=pltpu.PrefetchScalarGridSpec(
            num_scalar_prefetch=0,
            grid=grid,
            in_specs=in_specs,
            out_specs=out_spec,
        ),
        compiler_params=pltpu.CompilerParams(
            dimension_semantics=("parallel",),
            # Covers v5e's 16 MiB default scoped VMEM at TB=512; matches v6e/v7x defaults.
            vmem_limit_bytes=32 * 1024 * 1024,
        ),
        cost_estimate=pl.CostEstimate(
            flops=flops, transcendentals=0, bytes_accessed=bytes_accessed
        ),
    )(x, *flat_params)

    return out


def init_params(key):
    """Deterministic init mimicking PyTorch Linear default (U[-1/sqrt(fan_in), +])."""
    params = []
    for li in range(len(LAYER_DIMS) - 1):
        fan_in, fan_out = LAYER_DIMS[li], LAYER_DIMS[li + 1]
        key, kw, kb = jax.random.split(key, 3)
        bound = 1.0 / jnp.sqrt(fan_in)
        w = jax.random.uniform(kw, (fan_in, fan_out), jnp.float32, -bound, bound)
        b = jax.random.uniform(kb, (1, fan_out), jnp.float32, -bound, bound)
        params.append((w, b))
    return params


def ae_reference(x, params):
    """Pure-JAX reference mirroring the kernel's bf16-in / f32-accumulate math
    (unpadded weights; the zero padding in the kernel is mathematically inert)."""
    n = len(params)
    h = x.astype(jnp.bfloat16)
    for li, (w, b) in enumerate(params):
        acc = jnp.dot(
            h, w.astype(jnp.bfloat16), preferred_element_type=jnp.float32
        ) + b.astype(jnp.float32)
        if RELU_AFTER[li]:
            acc = jnp.maximum(acc, 0.0)
        h = acc.astype(jnp.bfloat16) if li < n - 1 else acc
    return h.astype(jnp.bfloat16)


if __name__ == "__main__":
    key = jax.random.PRNGKey(0)
    key, kx = jax.random.split(key)
    B = 64  # small test batch; gives an even grid of 2 steps (tb=32)
    x = jax.random.normal(kx, (B, 28 * 28), jnp.float32)

    params = init_params(key)
    flat_params = prepare_params(params)

    out = ae_forward(x, flat_params)
    out = jax.block_until_ready(out)

    ref = ae_reference(x, params)
    assert out.shape == (B, 28 * 28), out.shape
    err = float(
        jnp.max(jnp.abs(out.astype(jnp.float32) - ref.astype(jnp.float32)))
    )
    assert err < 5e-2, err
    print("KERNEL_OK")
</pallas_src>

<mosaic_0001>
module attributes {stable_mosaic.version = 11 : i64} {
  func.func @ae_kernel(%arg0: i32, %arg1: memref<32x784xf32, #tpu.memory_space<vmem>>, %arg2: memref<784x128xbf16, #tpu.memory_space<vmem>>, %arg3: memref<1x128xf32, #tpu.memory_space<vmem>>, %arg4: memref<128x128xbf16, #tpu.memory_space<vmem>>, %arg5: memref<1x128xf32, #tpu.memory_space<vmem>>, %arg6: memref<128x128xbf16, #tpu.memory_space<vmem>>, %arg7: memref<1x128xf32, #tpu.memory_space<vmem>>, %arg8: memref<128x128xbf16, #tpu.memory_space<vmem>>, %arg9: memref<1x128xf32, #tpu.memory_space<vmem>>, %arg10: memref<128x128xbf16, #tpu.memory_space<vmem>>, %arg11: memref<1x128xf32, #tpu.memory_space<vmem>>, %arg12: memref<128x128xbf16, #tpu.memory_space<vmem>>, %arg13: memref<1x128xf32, #tpu.memory_space<vmem>>, %arg14: memref<128x128xbf16, #tpu.memory_space<vmem>>, %arg15: memref<1x128xf32, #tpu.memory_space<vmem>>, %arg16: memref<128x128xbf16, #tpu.memory_space<vmem>>, %arg17: memref<1x128xf32, #tpu.memory_space<vmem>>, %arg18: memref<128x128xbf16, #tpu.memory_space<vmem>>, %arg19: memref<1x128xf32, #tpu.memory_space<vmem>>, %arg20: memref<128x784xbf16, #tpu.memory_space<vmem>>, %arg21: memref<1x784xf32, #tpu.memory_space<vmem>>, %arg22: memref<32x784xbf16, #tpu.memory_space<vmem>>) attributes {dimension_semantics = [#tpu.dimension_semantics<parallel>], iteration_bounds = array<i64: 2>, scalar_prefetch = 0 : i64, scratch_operands = 0 : i64, tpu.core_type = #tpu.core_type<tc>, window_params = [{transform_indices = @transform_0, window_bounds = array<i64: 32, 784>}, {pipeline_mode = #tpu.pipeline_mode<synchronous>, transform_indices = @transform_1, window_bounds = array<i64: 784, 128>}, {pipeline_mode = #tpu.pipeline_mode<synchronous>, transform_indices = @transform_2, window_bounds = array<i64: 1, 128>}, {pipeline_mode = #tpu.pipeline_mode<synchronous>, transform_indices = @transform_3, window_bounds = array<i64: 128, 128>}, {pipeline_mode = #tpu.pipeline_mode<synchronous>, transform_indices = @transform_4, window_bounds = array<i64: 1, 128>}, {pipeline_mode = #tpu.pipeline_mode<synchronous>, transform_indices = @transform_5, window_bounds = array<i64: 128, 128>}, {pipeline_mode = #tpu.pipeline_mode<synchronous>, transform_indices = @transform_6, window_bounds = array<i64: 1, 128>}, {pipeline_mode = #tpu.pipeline_mode<synchronous>, transform_indices = @transform_7, window_bounds = array<i64: 128, 128>}, {pipeline_mode = #tpu.pipeline_mode<synchronous>, transform_indices = @transform_8, window_bounds = array<i64: 1, 128>}, {pipeline_mode = #tpu.pipeline_mode<synchronous>, transform_indices = @transform_9, window_bounds = array<i64: 128, 128>}, {pipeline_mode = #tpu.pipeline_mode<synchronous>, transform_indices = @transform_10, window_bounds = array<i64: 1, 128>}, {pipeline_mode = #tpu.pipeline_mode<synchronous>, transform_indices = @transform_11, window_bounds = array<i64: 128, 128>}, {pipeline_mode = #tpu.pipeline_mode<synchronous>, transform_indices = @transform_12, window_bounds = array<i64: 1, 128>}, {pipeline_mode = #tpu.pipeline_mode<synchronous>, transform_indices = @transform_13, window_bounds = array<i64: 128, 128>}, {pipeline_mode = #tpu.pipeline_mode<synchronous>, transform_indices = @transform_14, window_bounds = array<i64: 1, 128>}, {pipeline_mode = #tpu.pipeline_mode<synchronous>, transform_indices = @transform_15, window_bounds = array<i64: 128, 128>}, {pipeline_mode = #tpu.pipeline_mode<synchronous>, transform_indices = @transform_16, window_bounds = array<i64: 1, 128>}, {pipeline_mode = #tpu.pipeline_mode<synchronous>, transform_indices = @transform_17, window_bounds = array<i64: 128, 128>}, {pipeline_mode = #tpu.pipeline_mode<synchronous>, transform_indices = @transform_18, window_bounds = array<i64: 1, 128>}, {pipeline_mode = #tpu.pipeline_mode<synchronous>, transform_indices = @transform_19, window_bounds = array<i64: 128, 784>}, {pipeline_mode = #tpu.pipeline_mode<synchronous>, transform_indices = @transform_20, window_bounds = array<i64: 1, 784>}, {transform_indices = @transform_21, window_bounds = array<i64: 32, 784>}]} {
    %c0 = arith.constant 0 : index
    %c0_0 = arith.constant 0 : index
    %0 = vector.load %arg1[%c0, %c0_0] : memref<32x784xf32, #tpu.memory_space<vmem>>, vector<32x784xf32>
    %1 = arith.truncf %0 : vector<32x784xf32> to vector<32x784xbf16>
    %c0_1 = arith.constant 0 : index
    %c0_2 = arith.constant 0 : index
    %2 = vector.load %arg2[%c0_1, %c0_2] : memref<784x128xbf16, #tpu.memory_space<vmem>>, vector<784x128xbf16>
    %c0_3 = arith.constant 0 : index
    %c0_4 = arith.constant 0 : index
    %3 = vector.load %arg3[%c0_3, %c0_4] : memref<1x128xf32, #tpu.memory_space<vmem>>, vector<1x128xf32>
    %cst = arith.constant dense<0.000000e+00> : vector<32x128xf32>
    %4 = tpu.matmul %1, %2, %cst {dimension_numbers = #tpu.dot_dimension_numbers<[1], [0], [0], [1], [0, 0, 1, 1], [], []>} : vector<32x784xbf16>, vector<784x128xbf16>, vector<32x128xf32> -> vector<32x128xf32>
    %5 = vector.broadcast %3 : vector<1x128xf32> to vector<32x128xf32>
    %6 = arith.addf %4, %5 : vector<32x128xf32>
    %cst_5 = arith.constant 0.000000e+00 : f32
    %7 = vector.broadcast %cst_5 : f32 to vector<32x128xf32>
    %8 = arith.maximumf %6, %7 : vector<32x128xf32>
    %9 = arith.truncf %8 : vector<32x128xf32> to vector<32x128xbf16>
    %c0_6 = arith.constant 0 : index
    %c0_7 = arith.constant 0 : index
    %10 = vector.load %arg4[%c0_6, %c0_7] : memref<128x128xbf16, #tpu.memory_space<vmem>>, vector<128x128xbf16>
    %c0_8 = arith.constant 0 : index
    %c0_9 = arith.constant 0 : index
    %11 = vector.load %arg5[%c0_8, %c0_9] : memref<1x128xf32, #tpu.memory_space<vmem>>, vector<1x128xf32>
    %cst_10 = arith.constant dense<0.000000e+00> : vector<32x128xf32>
    %12 = tpu.matmul %9, %10, %cst_10 {dimension_numbers = #tpu.dot_dimension_numbers<[1], [0], [0], [1], [0, 0, 1, 1], [], []>} : vector<32x128xbf16>, vector<128x128xbf16>, vector<32x128xf32> -> vector<32x128xf32>
    %13 = vector.broadcast %11 : vector<1x128xf32> to vector<32x128xf32>
    %14 = arith.addf %12, %13 : vector<32x128xf32>
    %cst_11 = arith.constant 0.000000e+00 : f32
    %15 = vector.broadcast %cst_11 : f32 to vector<32x128xf32>
    %16 = arith.maximumf %14, %15 : vector<32x128xf32>
    %17 = arith.truncf %16 : vector<32x128xf32> to vector<32x128xbf16>
    %c0_12 = arith.constant 0 : index
    %c0_13 = arith.constant 0 : index
    %18 = vector.load %arg6[%c0_12, %c0_13] : memref<128x128xbf16, #tpu.memory_space<vmem>>, vector<128x128xbf16>
    %c0_14 = arith.constant 0 : index
    %c0_15 = arith.constant 0 : index
    %19 = vector.load %arg7[%c0_14, %c0_15] : memref<1x128xf32, #tpu.memory_space<vmem>>, vector<1x128xf32>
    %cst_16 = arith.constant dense<0.000000e+00> : vector<32x128xf32>
    %20 = tpu.matmul %17, %18, %cst_16 {dimension_numbers = #tpu.dot_dimension_numbers<[1], [0], [0], [1], [0, 0, 1, 1], [], []>} : vector<32x128xbf16>, vector<128x128xbf16>, vector<32x128xf32> -> vector<32x128xf32>
    %21 = vector.broadcast %19 : vector<1x128xf32> to vector<32x128xf32>
    %22 = arith.addf %20, %21 : vector<32x128xf32>
    %cst_17 = arith.constant 0.000000e+00 : f32
    %23 = vector.broadcast %cst_17 : f32 to vector<32x128xf32>
    %24 = arith.maximumf %22, %23 : vector<32x128xf32>
    %25 = arith.truncf %24 : vector<32x128xf32> to vector<32x128xbf16>
    %c0_18 = arith.constant 0 : index
    %c0_19 = arith.constant 0 : index
    %26 = vector.load %arg8[%c0_18, %c0_19] : memref<128x128xbf16, #tpu.memory_space<vmem>>, vector<128x128xbf16>
    %c0_20 = arith.constant 0 : index
    %c0_21 = arith.constant 0 : index
    %27 = vector.load %arg9[%c0_20, %c0_21] : memref<1x128xf32, #tpu.memory_space<vmem>>, vector<1x128xf32>
    %cst_22 = arith.constant dense<0.000000e+00> : vector<32x128xf32>
    %28 = tpu.matmul %25, %26, %cst_22 {dimension_numbers = #tpu.dot_dimension_numbers<[1], [0], [0], [1], [0, 0, 1, 1], [], []>} : vector<32x128xbf16>, vector<128x128xbf16>, vector<32x128xf32> -> vector<32x128xf32>
    %29 = vector.broadcast %27 : vector<1x128xf32> to vector<32x128xf32>
    %30 = arith.addf %28, %29 : vector<32x128xf32>
    %cst_23 = arith.constant 0.000000e+00 : f32
    %31 = vector.broadcast %cst_23 : f32 to vector<32x128xf32>
    %32 = arith.maximumf %30, %31 : vector<32x128xf32>
    %33 = arith.truncf %32 : vector<32x128xf32> to vector<32x128xbf16>
    %c0_24 = arith.constant 0 : index
    %c0_25 = arith.constant 0 : index
    %34 = vector.load %arg10[%c0_24, %c0_25] : memref<128x128xbf16, #tpu.memory_space<vmem>>, vector<128x128xbf16>
    %c0_26 = arith.constant 0 : index
    %c0_27 = arith.constant 0 : index
    %35 = vector.load %arg11[%c0_26, %c0_27] : memref<1x128xf32, #tpu.memory_space<vmem>>, vector<1x128xf32>
    %cst_28 = arith.constant dense<0.000000e+00> : vector<32x128xf32>
    %36 = tpu.matmul %33, %34, %cst_28 {dimension_numbers = #tpu.dot_dimension_numbers<[1], [0], [0], [1], [0, 0, 1, 1], [], []>} : vector<32x128xbf16>, vector<128x128xbf16>, vector<32x128xf32> -> vector<32x128xf32>
    %37 = vector.broadcast %35 : vector<1x128xf32> to vector<32x128xf32>
    %38 = arith.addf %36, %37 : vector<32x128xf32>
    %39 = arith.truncf %38 : vector<32x128xf32> to vector<32x128xbf16>
    %c0_29 = arith.constant 0 : index
    %c0_30 = arith.constant 0 : index
    %40 = vector.load %arg12[%c0_29, %c0_30] : memref<128x128xbf16, #tpu.memory_space<vmem>>, vector<128x128xbf16>
    %c0_31 = arith.constant 0 : index
    %c0_32 = arith.constant 0 : index
    %41 = vector.load %arg13[%c0_31, %c0_32] : memref<1x128xf32, #tpu.memory_space<vmem>>, vector<1x128xf32>
    %cst_33 = arith.constant dense<0.000000e+00> : vector<32x128xf32>
    %42 = tpu.matmul %39, %40, %cst_33 {dimension_numbers = #tpu.dot_dimension_numbers<[1], [0], [0], [1], [0, 0, 1, 1], [], []>} : vector<32x128xbf16>, vector<128x128xbf16>, vector<32x128xf32> -> vector<32x128xf32>
    %43 = vector.broadcast %41 : vector<1x128xf32> to vector<32x128xf32>
    %44 = arith.addf %42, %43 : vector<32x128xf32>
    %cst_34 = arith.constant 0.000000e+00 : f32
    %45 = vector.broadcast %cst_34 : f32 to vector<32x128xf32>
    %46 = arith.maximumf %44, %45 : vector<32x128xf32>
    %47 = arith.truncf %46 : vector<32x128xf32> to vector<32x128xbf16>
    %c0_35 = arith.constant 0 : index
    %c0_36 = arith.constant 0 : index
    %48 = vector.load %arg14[%c0_35, %c0_36] : memref<128x128xbf16, #tpu.memory_space<vmem>>, vector<128x128xbf16>
    %c0_37 = arith.constant 0 : index
    %c0_38 = arith.constant 0 : index
    %49 = vector.load %arg15[%c0_37, %c0_38] : memref<1x128xf32, #tpu.memory_space<vmem>>, vector<1x128xf32>
    %cst_39 = arith.constant dense<0.000000e+00> : vector<32x128xf32>
    %50 = tpu.matmul %47, %48, %cst_39 {dimension_numbers = #tpu.dot_dimension_numbers<[1], [0], [0], [1], [0, 0, 1, 1], [], []>} : vector<32x128xbf16>, vector<128x128xbf16>, vector<32x128xf32> -> vector<32x128xf32>
    %51 = vector.broadcast %49 : vector<1x128xf32> to vector<32x128xf32>
    %52 = arith.addf %50, %51 : vector<32x128xf32>
    %cst_40 = arith.constant 0.000000e+00 : f32
    %53 = vector.broadcast %cst_40 : f32 to vector<32x128xf32>
    %54 = arith.maximumf %52, %53 : vector<32x128xf32>
    %55 = arith.truncf %54 : vector<32x128xf32> to vector<32x128xbf16>
    %c0_41 = arith.constant 0 : index
    %c0_42 = arith.constant 0 : index
    %56 = vector.load %arg16[%c0_41, %c0_42] : memref<128x128xbf16, #tpu.memory_space<vmem>>, vector<128x128xbf16>
    %c0_43 = arith.constant 0 : index
    %c0_44 = arith.constant 0 : index
    %57 = vector.load %arg17[%c0_43, %c0_44] : memref<1x128xf32, #tpu.memory_space<vmem>>, vector<1x128xf32>
    %cst_45 = arith.constant dense<0.000000e+00> : vector<32x128xf32>
    %58 = tpu.matmul %55, %56, %cst_45 {dimension_numbers = #tpu.dot_dimension_numbers<[1], [0], [0], [1], [0, 0, 1, 1], [], []>} : vector<32x128xbf16>, vector<128x128xbf16>, vector<32x128xf32> -> vector<32x128xf32>
    %59 = vector.broadcast %57 : vector<1x128xf32> to vector<32x128xf32>
    %60 = arith.addf %58, %59 : vector<32x128xf32>
    %cst_46 = arith.constant 0.000000e+00 : f32
    %61 = vector.broadcast %cst_46 : f32 to vector<32x128xf32>
    %62 = arith.maximumf %60, %61 : vector<32x128xf32>
    %63 = arith.truncf %62 : vector<32x128xf32> to vector<32x128xbf16>
    %c0_47 = arith.constant 0 : index
    %c0_48 = arith.constant 0 : index
    %64 = vector.load %arg18[%c0_47, %c0_48] : memref<128x128xbf16, #tpu.memory_space<vmem>>, vector<128x128xbf16>
    %c0_49 = arith.constant 0 : index
    %c0_50 = arith.constant 0 : index
    %65 = vector.load %arg19[%c0_49, %c0_50] : memref<1x128xf32, #tpu.memory_space<vmem>>, vector<1x128xf32>
    %cst_51 = arith.constant dense<0.000000e+00> : vector<32x128xf32>
    %66 = tpu.matmul %63, %64, %cst_51 {dimension_numbers = #tpu.dot_dimension_numbers<[1], [0], [0], [1], [0, 0, 1, 1], [], []>} : vector<32x128xbf16>, vector<128x128xbf16>, vector<32x128xf32> -> vector<32x128xf32>
    %67 = vector.broadcast %65 : vector<1x128xf32> to vector<32x128xf32>
    %68 = arith.addf %66, %67 : vector<32x128xf32>
    %cst_52 = arith.constant 0.000000e+00 : f32
    %69 = vector.broadcast %cst_52 : f32 to vector<32x128xf32>
    %70 = arith.maximumf %68, %69 : vector<32x128xf32>
    %71 = arith.truncf %70 : vector<32x128xf32> to vector<32x128xbf16>
    %c0_53 = arith.constant 0 : index
    %c0_54 = arith.constant 0 : index
    %72 = vector.load %arg20[%c0_53, %c0_54] : memref<128x784xbf16, #tpu.memory_space<vmem>>, vector<128x784xbf16>
    %c0_55 = arith.constant 0 : index
    %c0_56 = arith.constant 0 : index
    %73 = vector.load %arg21[%c0_55, %c0_56] : memref<1x784xf32, #tpu.memory_space<vmem>>, vector<1x784xf32>
    %cst_57 = arith.constant dense<0.000000e+00> : vector<32x784xf32>
    %74 = tpu.matmul %71, %72, %cst_57 {dimension_numbers = #tpu.dot_dimension_numbers<[1], [0], [0], [1], [0, 0, 1, 1], [], []>} : vector<32x128xbf16>, vector<128x784xbf16>, vector<32x784xf32> -> vector<32x784xf32>
    %75 = vector.broadcast %73 : vector<1x784xf32> to vector<32x784xf32>
    %76 = arith.addf %74, %75 : vector<32x784xf32>
    %77 = arith.truncf %76 : vector<32x784xf32> to vector<32x784xbf16>
    %c0_58 = arith.constant 0 : index
    %c0_59 = arith.constant 0 : index
    %78 = vector.load %arg22[%c0_58, %c0_59] : memref<32x784xbf16, #tpu.memory_space<vmem>>, vector<32x784xbf16>
    tpu.vector_store %arg22[%c0_58, %c0_59], %77 {strides = array<i32>} : memref<32x784xbf16, #tpu.memory_space<vmem>>, vector<32x784xbf16>,
    return
  }
  func.func @transform_0(%arg0: i32) -> (i32, i32) {
    %c0_i32 = arith.constant 0 : i32
    %c0_i32_0 = arith.constant 0 : i32
    return %arg0, %c0_i32 : i32, i32
  }
  func.func @transform_1(%arg0: i32) -> (i32, i32) {
    %c0_i32 = arith.constant 0 : i32
    %c0_i32_0 = arith.constant 0 : i32
    %c0_i32_1 = arith.constant 0 : i32
    return %c0_i32, %c0_i32_0 : i32, i32
  }
  func.func @transform_2(%arg0: i32) -> (i32, i32) {
    %c0_i32 = arith.constant 0 : i32
    %c0_i32_0 = arith.constant 0 : i32
    %c0_i32_1 = arith.constant 0 : i32
    return %c0_i32, %c0_i32_0 : i32, i32
  }
  func.func @transform_3(%arg0: i32) -> (i32, i32) {
    %c0_i32 = arith.constant 0 : i32
    %c0_i32_0 = arith.constant 0 : i32
    %c0_i32_1 = arith.constant 0 : i32
    return %c0_i32, %c0_i32_0 : i32, i32
  }
  func.func @transform_4(%arg0: i32) -> (i32, i32) {
    %c0_i32 = arith.constant 0 : i32
    %c0_i32_0 = arith.constant 0 : i32
    %c0_i32_1 = arith.constant 0 : i32
    return %c0_i32, %c0_i32_0 : i32, i32
  }
  func.func @transform_5(%arg0: i32) -> (i32, i32) {
    %c0_i32 = arith.constant 0 : i32
    %c0_i32_0 = arith.constant 0 : i32
    %c0_i32_1 = arith.constant 0 : i32
    return %c0_i32, %c0_i32_0 : i32, i32
  }
  func.func @transform_6(%arg0: i32) -> (i32, i32) {
    %c0_i32 = arith.constant 0 : i32
    %c0_i32_0 = arith.constant 0 : i32
    %c0_i32_1 = arith.constant 0 : i32
    return %c0_i32, %c0_i32_0 : i32, i32
  }
  func.func @transform_7(%arg0: i32) -> (i32, i32) {
    %c0_i32 = arith.constant 0 : i32
    %c0_i32_0 = arith.constant 0 : i32
    %c0_i32_1 = arith.constant 0 : i32
    return %c0_i32, %c0_i32_0 : i32, i32
  }
  func.func @transform_8(%arg0: i32) -> (i32, i32) {
    %c0_i32 = arith.constant 0 : i32
    %c0_i32_0 = arith.constant 0 : i32
    %c0_i32_1 = arith.constant 0 : i32
    return %c0_i32, %c0_i32_0 : i32, i32
  }
  func.func @transform_9(%arg0: i32) -> (i32, i32) {
    %c0_i32 = arith.constant 0 : i32
    %c0_i32_0 = arith.constant 0 : i32
    %c0_i32_1 = arith.constant 0 : i32
    return %c0_i32, %c0_i32_0 : i32, i32
  }
  func.func @transform_10(%arg0: i32) -> (i32, i32) {
    %c0_i32 = arith.constant 0 : i32
    %c0_i32_0 = arith.constant 0 : i32
    %c0_i32_1 = arith.constant 0 : i32
    return %c0_i32, %c0_i32_0 : i32, i32
  }
  func.func @transform_11(%arg0: i32) -> (i32, i32) {
    %c0_i32 = arith.constant 0 : i32
    %c0_i32_0 = arith.constant 0 : i32
    %c0_i32_1 = arith.constant 0 : i32
    return %c0_i32, %c0_i32_0 : i32, i32
  }
  func.func @transform_12(%arg0: i32) -> (i32, i32) {
    %c0_i32 = arith.constant 0 : i32
    %c0_i32_0 = arith.constant 0 : i32
    %c0_i32_1 = arith.constant 0 : i32
    return %c0_i32, %c0_i32_0 : i32, i32
  }
  func.func @transform_13(%arg0: i32) -> (i32, i32) {
    %c0_i32 = arith.constant 0 : i32
    %c0_i32_0 = arith.constant 0 : i32
    %c0_i32_1 = arith.constant 0 : i32
    return %c0_i32, %c0_i32_0 : i32, i32
  }
  func.func @transform_14(%arg0: i32) -> (i32, i32) {
    %c0_i32 = arith.constant 0 : i32
    %c0_i32_0 = arith.constant 0 : i32
    %c0_i32_1 = arith.constant 0 : i32
    return %c0_i32, %c0_i32_0 : i32, i32
  }
  func.func @transform_15(%arg0: i32) -> (i32, i32) {
    %c0_i32 = arith.constant 0 : i32
    %c0_i32_0 = arith.constant 0 : i32
    %c0_i32_1 = arith.constant 0 : i32
    return %c0_i32, %c0_i32_0 : i32, i32
  }
  func.func @transform_16(%arg0: i32) -> (i32, i32) {
    %c0_i32 = arith.constant 0 : i32
    %c0_i32_0 = arith.constant 0 : i32
    %c0_i32_1 = arith.constant 0 : i32
    return %c0_i32, %c0_i32_0 : i32, i32
  }
  func.func @transform_17(%arg0: i32) -> (i32, i32) {
    %c0_i32 = arith.constant 0 : i32
    %c0_i32_0 = arith.constant 0 : i32
    %c0_i32_1 = arith.constant 0 : i32
    return %c0_i32, %c0_i32_0 : i32, i32
  }
  func.func @transform_18(%arg0: i32) -> (i32, i32) {
    %c0_i32 = arith.constant 0 : i32
    %c0_i32_0 = arith.constant 0 : i32
    %c0_i32_1 = arith.constant 0 : i32
    return %c0_i32, %c0_i32_0 : i32, i32
  }
  func.func @transform_19(%arg0: i32) -> (i32, i32) {
    %c0_i32 = arith.constant 0 : i32
    %c0_i32_0 = arith.constant 0 : i32
    %c0_i32_1 = arith.constant 0 : i32
    return %c0_i32, %c0_i32_0 : i32, i32
  }
  func.func @transform_20(%arg0: i32) -> (i32, i32) {
    %c0_i32 = arith.constant 0 : i32
    %c0_i32_0 = arith.constant 0 : i32
    %c0_i32_1 = arith.constant 0 : i32
    return %c0_i32, %c0_i32_0 : i32, i32
  }
  func.func @transform_21(%arg0: i32) -> (i32, i32) {
    %c0_i32 = arith.constant 0 : i32
    %c0_i32_0 = arith.constant 0 : i32
    return %arg0, %c0_i32 : i32, i32
  }
}

</mosaic_0001>

<bundles_post_ra>
// kernel: ae_forward.1
= control target key start
LH: loop header
LB: loop body
LE: loop exit
PB: predicated region body
PF: predicated region fallthrough
CT: control target
= control target key end

     0   :  { %s5483_s0 = inlined_call_operand.vmem [shape: f32[64,784], index: 0, kind: input, shape index: {}]   ;;  %s5484_s1 = inlined_call_operand.vmem [shape: bf16[784,128], index: 1, kind: input, shape index: {}]   ;;  %s5485_s2 = inlined_call_operand.hbm [shape: f32[1,128], index: 2, kind: input, shape index: {}]   ;;  %s5486_s3 = inlined_call_operand.hbm [shape: bf16[128,128], index: 3, kind: input, shape index: {}]   ;;  %s5487_s4 = inlined_call_operand.vmem [shape: f32[1,128], index: 4, kind: input, shape index: {}]   ;;  %s5488_s5 = inlined_call_operand.hbm [shape: bf16[128,128], index: 5, kind: input, shape index: {}]   ;;  %s5489_s6 = inlined_call_operand.vmem [shape: f32[1,128], index: 6, kind: input, shape index: {}]   ;;  %s5490_s7 = inlined_call_operand.hbm [shape: bf16[128,128], index: 7, kind: input, shape index: {}]   ;;  %s5491_s8 = inlined_call_operand.vmem [shape: f32[1,128], index: 8, kind: input, shape index: {}]   ;;  %s5492_s9 = inlined_call_operand.hbm [shape: bf16[128,128], index: 9, kind: input, shape index: {}]   ;;  %s5493_s10 = inlined_call_operand.vmem [shape: f32[1,128], index: 10, kind: input, shape index: {}]   ;;  %s5494_s11 = inlined_call_operand.hbm [shape: bf16[128,128], index: 11, kind: input, shape index: {}]   ;;  %s5495_s12 = inlined_call_operand.vmem [shape: f32[1,128], index: 12, kind: input, shape index: {}]   ;;  %s5496_s13 = inlined_call_operand.hbm [shape: bf16[128,128], index: 13, kind: input, shape index: {}]   ;;  %s5497_s14 = inlined_call_operand.vmem [shape: f32[1,128], index: 14, kind: input, shape index: {}]   ;;  %s5498_s15 = inlined_call_operand.hbm [shape: bf16[128,128], index: 15, kind: input, shape index: {}]   ;;  %s5499_s16 = inlined_call_operand.vmem [shape: f32[1,128], index: 16, kind: input, shape index: {}]   ;;  %s5500_s17 = inlined_call_operand.hbm [shape: bf16[128,128], index: 17, kind: input, shape index: {}]   ;;  %s5501_s18 = inlined_call_operand.vmem [shape: f32[1,128], index: 18, kind: input, shape index: {}]   ;;  %s5502_s19 = inlined_call_operand.vmem [shape: bf16[128,784], index: 19, kind: input, shape index: {}]   ;;  %s5503_s20 = inlined_call_operand.vmem [shape: f32[1,784], index: 20, kind: input, shape index: {}]   ;;  %s5504_s21 = inlined_call_operand.hbm [shape: bf16[64,784], index: 21, kind: output, shape index: {}]  }
   0x1   :  { %5529 = sst [smem:[#allocation32_spill]] %s5483_s0 }
   0x2   :  { %5530 = sst [smem:[#allocation33_spill]] %s5484_s1 }
   0x3   :  { %5531 = sst [smem:[#allocation34_spill]] %s5485_s2 }
   0x4   :  { %5532 = sst [smem:[#allocation35_spill]] %s5486_s3 }
   0x5   :  { %5533 = sst [smem:[#allocation36_spill]] %s5487_s4 }
   0x6   :  { %5534 = sst [smem:[#allocation37_spill]] %s5488_s5 }
   0x7   :  { %5535 = sst [smem:[#allocation38_spill]] %s5490_s7 }
   0x8   :  { %5536 = sst [smem:[#allocation39_spill]] %s5499_s16 }
   0x9   :  { %5537 = sst [smem:[#allocation40_spill]] %s5501_s18 }
   0xa   :  { %5538 = sst [smem:[#allocation41_spill]] %s5503_s20 }
   0xb   :  { %5539 = sst [smem:[#allocation42_spill]] %s5504_s21 }
   0xc   :  { %26 = vsyncpa [#allocation3], 0 }
   0xd   :  { %27 = vsyncpa [#allocation6], 0 }
   0xe   :  { %28 = vsyncpa [#allocation9], 0 }
   0xf   :  { %29 = vsyncpa [#allocation12], 0 }
  0x10   :  { %30 = vsyncpa [#allocation15], 0 }
  0x11   :  { %31 = vsyncpa [#allocation4], 0 }
  0x12   :  { %33 = vsyncpa [#allocation4 + $0x1], 0  ;;  %s4708_s2 = smov 0   ;;  %s4710_s25 = smov 0  }
  0x13   :  { %s4712_s26 = smov 0   ;;  %s4714_s27 = smov 0  }
  0x14 LB: > { %5540 = sst [smem:[#allocation24_spill]] %s4569_s2  ;;  %s4729_s3 = sadd.s32 4294967295, %s4581_s27   ;;  %s4581_s27 = sphi %s4714_s27, %s5584_s27   ;;  %s4577_s26 = sphi %s4712_s26, %s5587_s26   ;;  %s4573_s25 = sphi %s4710_s25, %s5586_s25   ;;  %s4569_s2 = sphi %s4708_s2, %s5585_s2  }
  0x15   : > { %5541 = sst [smem:[#allocation25_spill]] %s4573_s25  ;;  %s3312_s28 = sadd.s32 4294967294, %s4581_s27  }
  0x16   : > { %5542 = sst [smem:[#allocation26_spill]] %s4577_s26  ;;  %s4733_s29 = sadd.s32 1, %s4581_s27  }
  0x17   : > { %5543 = sst [smem:[#allocation27_spill]] %s4581_s27  ;;  %s492_s0 = sadd.s32 1, %s4577_s26 }
  0x18   : > { %5544 = sst [smem:[#allocation28_spill]] %s4733_s29  ;;  %s489_s4 = ssub.s32 %s4581_s27, %s4733_s29 }
  0x19   : > { %p502_p0 = scmp.ne.s32.totalorder %s4577_s26, %s4573_s25  ;;  %p490_p1 = scmp.eq.s32.totalorder %s489_s4, 0 }
  0x1a   : > { %p503_p2 = scmp.eq.s32.totalorder %s4729_s3, 1  ;;  %p508_p3 = scmp.ne.s32.totalorder %s4573_s25, %s4569_s2 }
  0x1b   : > { %p509_p4 = scmp.eq.s32.totalorder %s3312_s28, 1  ;;  %p3313_p7 = scmp.ge.s32.totalorder %s4581_s27, 1 }
  0x1c   : > { %s4744_s30 = scalar_select %p490_p1, %s4577_s26, %s492_s0  }
  0x1d   : > { %p4746_p5 = por %p503_p2, %p502_p0  ;;  %p4750_p6 = por %p509_p4, %p508_p3 }
  0x1e   : > { %5545 = sst [smem:[#allocation29_spill]] %s4744_s30  ;;  %p516_p8 = scmp.lt.s32.totalorder %s4581_s27, 3 }
  0x1f   : > { %s5546_s5 = scalar_select %p4746_p5, 1, 0 }
  0x20   : > { %s5548_s22 = scalar_select %p4750_p6, 1, 0 }
  0x21   : > { %5547 = sst [smem:[#allocation30_spill]] %s5546_s5  ;;  %p5518_p9 = scmp.eq.s32.totalorder %s4729_s3, 0 }
  0x22   : > { %5549 = sst [smem:[#allocation31_spill]] %s5548_s22  ;;  %p4757_p10 = pnand %p3313_p7, %p516_p8 }
  0x23   : > { %s4583_s1 = smov [#allocation5]   ;;  %s4584_s0 = smov [#allocation8]  }
  0x24   : > { %s5550_s23 = scalar_select %p4757_p10, 1, 0 }
  0x25   : > { %s542_s24 = sshll.u32 %s4583_s1, 4  ;;  %p3957_p11 = pneg %p4757_p10  ;;  %s4763_s24 = int_to_ptr.vmem [resolvable:$true] %s542_s24 }
  0x26   : > { %s574_s4 = sshll.u32 %s4584_s0, 4  ;;  %s4585_s30 = smov [#allocation11]   ;;  %s4771_s4 = int_to_ptr.vmem [resolvable:$true] %s574_s4 }
  0x27   : > { %p4767_p12 = pnand %p5518_p9, %p3957_p11  ;;  %s4773_s26 = sshll.u32 %s4585_s30, 4  ;;  %s607_s26 = int_to_ptr.vmem [resolvable:$true] %s4773_s26 }
  0x28   : > { %s5552_s1 = sld [smem:[#allocation35_spill]] }
  0x29   : > { %p4783_p0 = pneg %p4767_p12 }
  0x2e   : > { %s4247_s2 = scalar_lea.hbm %s5552_s1, 1024 }
  0x2f   : > { %p4248_p13 = scmp.ne.s32.totalorder %s5552_s1, %s4247_s2  ;;  %p4254_p3 = scmp.lt.u32.totalorder %s4247_s2, %s5552_s1 }
  0x31   : > { %p4250_p1 = pnand %p4783_p0, %p4248_p13 }
  0x33   : > { %p4251_p2 = pneg %p4250_p1 }
  0x35   : > { %p4256_p4 = pnand %p4254_p3, %p4251_p2 }
  0x37   : > { %4259 = shalt.err (!%p4256_p4)
}
  0x38   : > { %s4260_s21 = scalar_lea.vmem %s4763_s24, 1024  ;;  %p4268_p9 = scmp.lt.s32.totalorder %s4763_s24, %s4763_s24 }
  0x39   : > { %p4261_p7 = scmp.ne.s32.totalorder %s4763_s24, %s4260_s21  ;;  %p4269_p6 = scmp.lt.s32.totalorder %s4260_s21, %s4260_s21 }
  0x3b   : > { %p4263_p8 = pnand %p4261_p7, %p4783_p0  ;;  %p4270_p13 = por %p4269_p6, %p4268_p9 }
  0x3d   : > { %p4264_p11 = pneg %p4263_p8 }
  0x3f   : > { %p4271_p1 = pnand %p4270_p13, %p4264_p11 }
  0x41   : > { %4274 = shalt.err (!%p4271_p1)
}
  0x42   : > { %s5524_s27 = smov 64   ;;  %s5526_s2 = smov 4  }
  0x43   : > { %3963 = dma.hbm_to_vmem [thread:$0]  (!%p4767_p12), %s5552_s1, 1024, %s4763_s24, [#allocation6], %s5524_s27, %s5524_s27, %s5526_s2  }
  0x44   : > { %s5554_s7 = sld [smem:[#allocation38_spill]] }
  0x4a   : > { %s4275_s21 = scalar_lea.hbm %s5554_s7, 1024 }
  0x4b   : > { %p4276_p6 = scmp.ne.s32.totalorder %s5554_s7, %s4275_s21  ;;  %p4282_p3 = scmp.lt.u32.totalorder %s4275_s21, %s5554_s7 }
  0x4d   : > { %p4278_p9 = pnand %p4276_p6, %p4783_p0 }
  0x4f   : > { %p4279_p2 = pneg %p4278_p9 }
  0x51   : > { %p4284_p4 = pnand %p4282_p3, %p4279_p2 }
  0x53   : > { %4287 = shalt.err (!%p4284_p4)
}
  0x54   : > { %s4288_s24 = scalar_lea.vmem %s4771_s4, 1024  ;;  %p4296_p13 = scmp.lt.s32.totalorder %s4771_s4, %s4771_s4 }
  0x55   : > { %p4289_p7 = scmp.ne.s32.totalorder %s4771_s4, %s4288_s24  ;;  %p4297_p1 = scmp.lt.s32.totalorder %s4288_s24, %s4288_s24 }
  0x57   : > { %p4291_p8 = pnand %p4289_p7, %p4783_p0  ;;  %p4298_p6 = por %p4297_p1, %p4296_p13 }
  0x59   : > { %p4292_p11 = pneg %p4291_p8 }
  0x5b   : > { %p4299_p9 = pnand %p4298_p6, %p4292_p11 }
  0x5d   : > { %4302 = shalt.err (!%p4299_p9)
}
  0x5e   : > { %3969 = dma.hbm_to_vmem [thread:$0]  (!%p4767_p12), %s5554_s7, 1024, %s4771_s4, [#allocation9], %s5524_s27, %s5524_s27, %s5526_s2  }
  0x5f   : > { %s4303_s29 = scalar_lea.hbm %s5494_s11, 1024 }
  0x60   : > { %p4304_p2 = scmp.ne.s32.totalorder %s5494_s11, %s4303_s29  ;;  %p4310_p7 = scmp.lt.u32.totalorder %s4303_s29, %s5494_s11 }
  0x62   : > { %p4306_p3 = pnand %p4304_p2, %p4783_p0 }
  0x64   : > { %p4307_p4 = pneg %p4306_p3 }
  0x66   : > { %p4312_p8 = pnand %p4310_p7, %p4307_p4 }
  0x68   : > { %4315 = shalt.err (!%p4312_p8)
}
  0x69   : > { %s4316_s24 = scalar_lea.vmem %s607_s26, 1024  ;;  %p4324_p6 = scmp.lt.s32.totalorder %s607_s26, %s607_s26 }
  0x6a   : > { %p4317_p11 = scmp.ne.s32.totalorder %s607_s26, %s4316_s24  ;;  %p4325_p9 = scmp.lt.s32.totalorder %s4316_s24, %s4316_s24 }
  0x6c   : > { %p4319_p13 = pnand %p4317_p11, %p4783_p0  ;;  %p4326_p5 = por %p4325_p9, %p4324_p6 }
  0x6e   : > { %p4320_p1 = pneg %p4319_p13 }
  0x70   : > { %p4327_p10 = pnand %p4326_p5, %p4320_p1 }
  0x72   : > { %4330 = shalt.err (!%p4327_p10)
}
  0x73   : > { %3975 = dma.hbm_to_vmem [thread:$0]  (!%p4767_p12), %s5494_s11, 1024, %s607_s26, [#allocation12], %s5524_s27, %s5524_s27, %s5526_s2  }
  0x74   : > { %s4588_s18 = smov [#allocation14]   ;;  %s4589_s25 = smov [#allocation2]  }
  0x75   : > { %s638_s20 = sshll.u32 %s4588_s18, 4  ;;  %s532_s29 = sshll.u32 %s4589_s25, 4  ;;  %s639_s20 = int_to_ptr.vmem [resolvable:$true] %s638_s20  ;;  %s533_s29 = int_to_ptr.vmem [resolvable:$true] %s532_s29 }
  0x76   : > { %s4331_s30 = scalar_lea.hbm %s5498_s15, 1024 }
  0x77   : > { %p4332_p5 = scmp.ne.s32.totalorder %s5498_s15, %s4331_s30  ;;  %p4338_p3 = scmp.lt.u32.totalorder %s4331_s30, %s5498_s15 }
  0x79   : > { %p4334_p10 = pnand %p4332_p5, %p4783_p0 }
  0x7b   : > { %p4335_p2 = pneg %p4334_p10 }
  0x7d   : > { %p4340_p4 = pnand %p4338_p3, %p4335_p2 }
  0x7f   : > { %4343 = shalt.err (!%p4340_p4)
}
  0x80   : > { %s4344_s26 = scalar_lea.vmem %s639_s20, 1024  ;;  %p4352_p13 = scmp.lt.s32.totalorder %s639_s20, %s639_s20 }
  0x81   : > { %p4345_p7 = scmp.ne.s32.totalorder %s639_s20, %s4344_s26  ;;  %p4353_p1 = scmp.lt.s32.totalorder %s4344_s26, %s4344_s26 }
  0x83   : > { %p4347_p8 = pnand %p4345_p7, %p4783_p0  ;;  %p4354_p6 = por %p4353_p1, %p4352_p13 }
  0x85   : > { %p4348_p11 = pneg %p4347_p8 }
  0x87   : > { %p4355_p9 = pnand %p4354_p6, %p4348_p11 }
  0x89   : > { %4358 = shalt.err (!%p4355_p9)
}
  0x8a   : > { %3981 = dma.hbm_to_vmem [thread:$0]  (!%p4767_p12), %s5498_s15, 1024, %s639_s20, [#allocation15], %s5524_s27, %s5524_s27, %s5526_s2  }
  0x8b   : > { %s5555_s22 = sld [smem:[#allocation34_spill]] }
  0x91   : > { %s4359_s0 = scalar_lea.hbm %s5555_s22, 16 }
  0x92   : > { %p4360_p5 = scmp.ne.s32.totalorder %s5555_s22, %s4359_s0  ;;  %p4366_p3 = scmp.lt.u32.totalorder %s4359_s0, %s5555_s22 }
  0x94   : > { %p4362_p10 = pnand %p4360_p5, %p4783_p0 }
  0x96   : > { %p4363_p2 = pneg %p4362_p10 }
  0x98   : > { %p4368_p4 = pnand %p4366_p3, %p4363_p2 }
  0x9a   : > { %4371 = shalt.err (!%p4368_p4)
}
  0x9b   : > { %s4372_s26 = scalar_lea.vmem %s533_s29, 16  ;;  %s4379_s20 = scalar_lea.vmem %s533_s29, 32 }
  0x9c   : > { %p4373_p7 = scmp.ne.s32.totalorder %s533_s29, %s4372_s26  ;;  %p4380_p13 = scmp.lt.s32.totalorder %s533_s29, %s533_s29 }
  0x9d   : > { %p4381_p1 = scmp.lt.s32.totalorder %s4379_s20, %s4372_s26 }
  0x9e   : > { %p4375_p8 = pnand %p4373_p7, %p4783_p0 }
  0x9f   : > { %p4382_p6 = por %p4381_p1, %p4380_p13 }
  0xa0   : > { %p4376_p11 = pneg %p4375_p8 }
  0xa2   : > { %p4383_p9 = pnand %p4382_p6, %p4376_p11 }
  0xa4   : > { %4386 = shalt.err (!%p4383_p9)
}
  0xa5   : > { %3960 = dma.hbm_to_vmem [thread:$0]  (!%p4767_p12), %s5555_s22, 16, %s533_s29, [#allocation3]  }
  0xa6   : > { %s4590_s18 = smov [#allocation7]   ;;  %s4591_s0 = smov [#allocation10]  }
  0xa7   : > { %s558_s25 = sshll.u32 %s4590_s18, 4  ;;  %s590_s30 = sshll.u32 %s4591_s0, 4  ;;  %s559_s25 = int_to_ptr.vmem [resolvable:$true] %s558_s25  ;;  %s591_s30 = int_to_ptr.vmem [resolvable:$true] %s590_s30 }
  0xa8   : > { %s5556_s4 = sld [smem:[#allocation37_spill]] }
  0xae   : > { %s4387_s27 = scalar_lea.hbm %s5556_s4, 1024 }
  0xaf   : > { %p4388_p5 = scmp.ne.s32.totalorder %s5556_s4, %s4387_s27  ;;  %p4394_p3 = scmp.lt.u32.totalorder %s4387_s27, %s5556_s4 }
  0xb1   : > { %p4390_p10 = pnand %p4388_p5, %p4783_p0 }
  0xb3   : > { %p4391_p2 = pneg %p4390_p10 }
  0xb5   : > { %p4396_p4 = pnand %p4394_p3, %p4391_p2 }
  0xb7   : > { %4399 = shalt.err (!%p4396_p4)
}
  0xb8   : > { %s4400_s29 = scalar_lea.vmem %s559_s25, 1024  ;;  %p4408_p13 = scmp.lt.s32.totalorder %s559_s25, %s559_s25 }
  0xb9   : > { %p4401_p7 = scmp.ne.s32.totalorder %s559_s25, %s4400_s29  ;;  %p4409_p1 = scmp.lt.s32.totalorder %s4400_s29, %s4400_s29 }
  0xbb   : > { %p4403_p8 = pnand %p4401_p7, %p4783_p0  ;;  %p4410_p6 = por %p4409_p1, %p4408_p13 }
  0xbd   : > { %p4404_p11 = pneg %p4403_p8 }
  0xbf   : > { %p4411_p9 = pnand %p4410_p6, %p4404_p11 }
  0xc1   : > { %4414 = shalt.err (!%p4411_p9)
}
  0xc2   : > { %s5557_s16 = smov 4   ;;  %s5558_s18 = smov 64  }
  0xc3   : > { %3966 = dma.hbm_to_vmem [thread:$0]  (!%p4767_p12), %s5556_s4, 1024, %s559_s25, [#allocation6], %s5558_s18, %s5558_s18, %s5557_s16  }
  0xc4   : > { %s4415_s24 = scalar_lea.hbm %s5492_s9, 1024 }
  0xc5   : > { %p4416_p5 = scmp.ne.s32.totalorder %s5492_s9, %s4415_s24  ;;  %p4422_p3 = scmp.lt.u32.totalorder %s4415_s24, %s5492_s9 }
  0xc7   : > { %p4418_p10 = pnand %p4416_p5, %p4783_p0 }
  0xc9   : > { %p4419_p2 = pneg %p4418_p10 }
  0xcb   : > { %p4424_p4 = pnand %p4422_p3, %p4419_p2 }
  0xcd   : > { %4427 = shalt.err (!%p4424_p4)
}
  0xce   : > { %s4428_s2 = scalar_lea.vmem %s591_s30, 1024  ;;  %p4436_p13 = scmp.lt.s32.totalorder %s591_s30, %s591_s30 }
  0xcf   : > { %p4429_p7 = scmp.ne.s32.totalorder %s591_s30, %s4428_s2  ;;  %p4437_p1 = scmp.lt.s32.totalorder %s4428_s2, %s4428_s2 }
  0xd1   : > { %p4431_p8 = pnand %p4429_p7, %p4783_p0  ;;  %p4438_p6 = por %p4437_p1, %p4436_p13 }
  0xd3   : > { %p4432_p11 = pneg %p4431_p8 }
  0xd5   : > { %p4439_p9 = pnand %p4438_p6, %p4432_p11 }
  0xd7   : > { %4442 = shalt.err (!%p4439_p9)
}
  0xd8   : > { %3972 = dma.hbm_to_vmem [thread:$0]  (!%p4767_p12), %s5492_s9, 1024, %s591_s30, [#allocation9], %s5558_s18, %s5558_s18, %s5557_s16  }
  0xd9   : > { %s4592_s0 = smov [#allocation13]   ;;  %s4593_s24 = smov [#allocation16]  }
  0xda   : > { %s622_s21 = sshll.u32 %s4592_s0, 4  ;;  %s654_s26 = sshll.u32 %s4593_s24, 4  ;;  %s623_s21 = int_to_ptr.vmem [resolvable:$true] %s622_s21  ;;  %s655_s26 = int_to_ptr.vmem [resolvable:$true] %s654_s26 }
  0xdb   : > { %s4443_s29 = scalar_lea.hbm %s5496_s13, 1024 }
  0xdc   : > { %p4444_p5 = scmp.ne.s32.totalorder %s5496_s13, %s4443_s29  ;;  %p4450_p3 = scmp.lt.u32.totalorder %s4443_s29, %s5496_s13 }
  0xde   : > { %p4446_p10 = pnand %p4444_p5, %p4783_p0 }
  0xe0   : > { %p4447_p2 = pneg %p4446_p10 }
  0xe2   : > { %p4452_p4 = pnand %p4450_p3, %p4447_p2 }
  0xe4   : > { %4455 = shalt.err (!%p4452_p4)
}
  0xe5   : > { %s4456_s30 = scalar_lea.vmem %s623_s21, 1024  ;;  %p4464_p13 = scmp.lt.s32.totalorder %s623_s21, %s623_s21 }
  0xe6   : > { %p4457_p7 = scmp.ne.s32.totalorder %s623_s21, %s4456_s30  ;;  %p4465_p1 = scmp.lt.s32.totalorder %s4456_s30, %s4456_s30 }
  0xe8   : > { %p4459_p8 = pnand %p4457_p7, %p4783_p0  ;;  %p4466_p6 = por %p4465_p1, %p4464_p13 }
  0xea   : > { %p4460_p11 = pneg %p4459_p8 }
  0xec   : > { %p4467_p9 = pnand %p4466_p6, %p4460_p11 }
  0xee   : > { %4470 = shalt.err (!%p4467_p9)
}
  0xef   : > { %3978 = dma.hbm_to_vmem [thread:$0]  (!%p4767_p12), %s5496_s13, 1024, %s623_s21, [#allocation12], %s5558_s18, %s5558_s18, %s5557_s16  }
  0xf0   : > { %s4471_s24 = scalar_lea.hbm %s5500_s17, 1024 }
  0xf1   : > { %p4472_p5 = scmp.ne.s32.totalorder %s5500_s17, %s4471_s24  ;;  %p4478_p3 = scmp.lt.u32.totalorder %s4471_s24, %s5500_s17 }
  0xf3   : > { %p4474_p10 = pnand %p4472_p5, %p4783_p0 }
  0xf5   : > { %p4475_p2 = pneg %p4474_p10 }
  0xf7   : > { %p4480_p4 = pnand %p4478_p3, %p4475_p2 }
  0xf9   : > { %4483 = shalt.err (!%p4480_p4)
}
  0xfa   : > { %s4484_s25 = scalar_lea.vmem %s655_s26, 1024  ;;  %p4492_p13 = scmp.lt.s32.totalorder %s655_s26, %s655_s26 }
  0xfb   : > { %p4485_p7 = scmp.ne.s32.totalorder %s655_s26, %s4484_s25  ;;  %p4493_p1 = scmp.lt.s32.totalorder %s4484_s25, %s4484_s25 }
  0xfd   : > { %p4487_p8 = pnand %p4485_p7, %p4783_p0  ;;  %p4494_p6 = por %p4493_p1, %p4492_p13 }
  0xff   : > { %p4488_p11 = pneg %p4487_p8 }
 0x101   : > { %p4495_p9 = pnand %p4494_p6, %p4488_p11 }
 0x103   : > { %4498 = shalt.err (!%p4495_p9)
}
 0x104   : > { %3984 = dma.hbm_to_vmem [thread:$0]  (!%p4767_p12), %s5500_s17, 1024, %s655_s26, [#allocation15], %s5558_s18, %s5558_s18, %s5557_s16  }
 0x105   : > { %p5559_p5 = scmp.ne.s32.totalorder %s5550_s23, 0 }
 0x106   : > { %p5560_p0 = scmp.eq.s32.totalorder (!%p5559_p5), %s4729_s3, 0 }
 0x107   : > { %689 = sbr.rel (%p5559_p5) target bundleno = 2634 (0xa4a), region = 104 }
 0x10e   : > { %4544 = dma.done.wait (%p5560_p0), [#allocation3], 16   ;;  %p5561_p10 = pmov %p5560_p0 }
 0x10f   : > { %p5562_p2 = pmov %p5560_p0 }
 0x110   : > { %4546 = vsyncadd (%p5561_p10), [#allocation3], 4294967280 }
 0x111   : > { %4548 = dma.done.wait (%p5562_p2), [#allocation6], 2048   ;;  %p5563_p3 = pmov %p5560_p0 }
 0x112   : > { %p5564_p4 = pmov %p5560_p0 }
 0x113   : > { %4550 = vsyncadd (%p5563_p3), [#allocation6], 4294965248 }
 0x114   : > { %4552 = dma.done.wait (%p5564_p4), [#allocation9], 2048   ;;  %p5565_p12 = pmov %p5560_p0 }
 0x115   : > { %p5566_p7 = pmov %p5560_p0 }
 0x116   : > { %4554 = vsyncadd (%p5565_p12), [#allocation9], 4294965248 }
 0x117   : > { %4556 = dma.done.wait (%p5566_p7), [#allocation12], 2048   ;;  %p5567_p8 = pmov %p5560_p0 }
 0x118   : > { %p5568_p11 = pmov %p5560_p0 }
 0x119   : > { %4558 = vsyncadd (%p5567_p8), [#allocation12], 4294965248 }
 0x11a   : > { %4560 = dma.done.wait (%p5568_p11), [#allocation15], 2048   ;;  %p5569_p13 = pmov %p5560_p0 }
 0x11b   : > { %s5570_s28 = sld [smem:[#allocation33_spill]]  ;;  %s3334_s1 = sshll.u32 %s4729_s3, 2  ;;  %vm1232_vm0 = vcmask 130048   ;;  %vm3133_vm1 = vcmask 125952  }
 0x11c   : > { %4562 = vsyncadd (%p5569_p13), [#allocation15], 4294965248  ;;  %p783_p1 = scmp.lt.s32.totalorder %s3334_s1, 7  ;;  %s5571_s29 = sld [smem:[#allocation32_spill]] }
 0x11d   : > { %s5572_s4 = sld [smem:[#allocation36_spill]]  ;;  %s5573_s20 = sld [smem:[#allocation39_spill]] }
 0x11e   : > { %s5589_s1 = smov (!%p783_p1, %s3334_s1), 7  ;;  %s5574_s7 = sld [smem:[#allocation40_spill]] }
 0x11f   : > { %s3917_s23 = smul.u32 56, %s5589_s1  ;;  %s5575_s5 = sld [smem:[#allocation25_spill]] }
 0x120   : > { %s5576_s18 = sld [smem:[#allocation41_spill]]  ;;  %s4595_s21 = smov [#allocation17]  }
 0x121   : > { %v4054_v0 = vld [vmem:[%s5570_s28 + $0x40] sm:$0xff]   ;;  %v4058_v4 = vld [vmem:[%s5570_s28 + $0x48] sm:$0xff]   ;;  %v4062_v8 = vld [vmem:[%s5570_s28 + $0x50] sm:$0xff]   ;;  %s5577_s27 = sld [smem:[#allocation30_spill]]  ;;  %s4503_s30 = sshll.u32 %s4595_s21, 4  ;;  %s4504_s30 = int_to_ptr.vmem [resolvable:$false] %s4503_s30 }
 0x122   : > { %v4055_v1 = vld [vmem:[%s5570_s28] sm:$0xff]   ;;  %3553 = vmatprep.subr.bf16.mxu0 %v4054_v0  ;;  %v4059_v5 = vld [vmem:[%s5570_s28 + $0x8] sm:$0xff]   ;;  %v4063_v9 = vld [vmem:[%s5570_s28 + $0x10] sm:$0xff]   ;;  %s5091_s2 = scalar_lea.vmem %s5571_s29, %s3917_s23  ;;  %s4505_s23 = scalar_lea.vmem %s4504_s30, 3584 }
 0x123   : > { %v4056_v2 = vld [vmem:[%s5570_s28 + $0xc0] sm:$0xff]   ;;  %3554 = vmatpush3.bf16.msra.mxu0 %v4055_v1  ;;  %v4060_v6 = vld [vmem:[%s5570_s28 + $0xc8] sm:$0xff]   ;;  %v4064_v10 = vld [vmem:[%s5570_s28 + $0xd0] sm:$0xff]  }
 0x124   : > { %v4057_v3 = vld [vmem:[%s5570_s28 + $0x80] sm:$0xff]   ;;  %3581 = vmatprep.subr.bf16.mxu1 %v4056_v2  ;;  %3555 = vmatprep.subr.bf16.mxu0 %v4058_v4  ;;  %v4061_v7 = vld [vmem:[%s5570_s28 + $0x88] sm:$0xff]   ;;  %v4065_v11 = vld [vmem:[%s5570_s28 + $0x90] sm:$0xff]  }
 0x125   : > { %3582 = vmatpush3.bf16.msra.mxu1 %v4057_v3  ;;  %v4066_v12 = vld [vmem:[%s5570_s28 + $0x58] sm:$0xff]   ;;  %v4070_v16 = vld [vmem:[%s5570_s28 + $0x60] sm:$0xff]   ;;  %v4074_v20 = vld [vmem:[%s5570_s28 + $0x68] sm:$0xff]   ;;  %s779_s26 = sand.u32 1, %s5575_s5  }
 0x126   : > { %3583 = vmatprep.subr.bf16.mxu1 %v4060_v6  ;;  %v4067_v13 = vld [vmem:[%s5570_s28 + $0x18] sm:$0xff]   ;;  %v4071_v17 = vld [vmem:[%s5570_s28 + $0x20] sm:$0xff]   ;;  %v4075_v21 = vld [vmem:[%s5570_s28 + $0x28] sm:$0xff]  }
 0x127   : > { %3556 = vmatpush3.bf16.msra.mxu0 %v4059_v5  ;;  %v4068_v14 = vld [vmem:[%s5570_s28 + $0xd8] sm:$0xff]   ;;  %v4072_v18 = vld [vmem:[%s5570_s28 + $0xe0] sm:$0xff]   ;;  %v4076_v22 = vld [vmem:[%s5570_s28 + $0xe8] sm:$0xff]   ;;  %p5579_p9 = scmp.ne.s32.totalorder %s5577_s27, 0 }
 0x128   : > { %3557 = vmatprep.subr.bf16.mxu0 %v4062_v8  ;;  %v4069_v15 = vld [vmem:[%s5570_s28 + $0x98] sm:$0xff]   ;;  %v4073_v19 = vld [vmem:[%s5570_s28 + $0xa0] sm:$0xff]   ;;  %v4077_v23 = vld [vmem:[%s5570_s28 + $0xa8] sm:$0xff]  }
 0x129   : > { %3584 = vmatpush3.bf16.msra.mxu1 %v4061_v7  ;;  %v4078_v24 = vld [vmem:[%s5570_s28 + $0x70] sm:$0xff]   ;;  %v4082_v28 = vld [vmem:[%s5570_s28 + $0x78] sm:$0xff]   ;;  %v792_v31 = vld [vmem:[%s5091_s2 + $0x8] sm:$0xff] }
 0x12a   : > { %3585 = vmatprep.subr.bf16.mxu1 %v4064_v10  ;;  %v4079_v25 = vld [vmem:[%s5570_s28 + $0x30] sm:$0xff]   ;;  %v4083_v29 = vld [vmem:[%s5570_s28 + $0x38] sm:$0xff]   ;;  %v799_v32 = vld [vmem:[%s5091_s2 + $0x40] sm:$0xff] }
 0x12b   : > { %3558 = vmatpush3.bf16.msra.mxu0 %v4063_v9  ;;  %v4080_v26 = vld [vmem:[%s5570_s28 + $0xf0] sm:$0xff]   ;;  %v4084_v30 = vld [vmem:[%s5570_s28 + $0xf8] sm:$0xff]   ;;  %v820_v33 = vpack.c.bf16 %v799_v32, %v792_v31  ;;  %v791_v35 = vld [vmem:[%s5091_s2] sm:$0xff] }
 0x12c   : > { %3559 = vmatprep.subr.bf16.mxu0 %v4066_v12  ;;  %v4081_v27 = vld [vmem:[%s5570_s28 + $0xb0] sm:$0xff]   ;;  %v4085_v34 = vld [vmem:[%s5570_s28 + $0xb8] sm:$0xff]   ;;  %v4086_v38 = vld [vmem:[%s5570_s28 + $0x140] sm:$0xff]  }
 0x12d   : > { %3586 = vmatpush3.bf16.msra.mxu1 %v4065_v11  ;;  %v798_v36 = vld [vmem:[%s5091_s2 + $0x38] sm:$0xff]  ;;  %1271 = vmatprep.mubr.bf16.mxu0 %v820_v33  ;;  %v801_v40 = vld [vmem:[%s5091_s2 + $0x50] sm:$0xff]  ;;  %v4087_v42 = vld [vmem:[%s5570_s28 + $0x100] sm:$0xff]  }
 0x12e   : > { %3587 = vmatprep.subr.bf16.mxu1 %v4068_v14  ;;  %v819_v37 = vpack.c.bf16 %v798_v36, %v791_v35  ;;  %v794_v39 = vld [vmem:[%s5091_s2 + $0x18] sm:$0xff]  ;;  %v793_v43 = vld [vmem:[%s5091_s2 + $0x10] sm:$0xff]  ;;  %v800_v44 = vld [vmem:[%s5091_s2 + $0x48] sm:$0xff] }
 0x12f   : > { %3560 = vmatpush3.bf16.msra.mxu0 %v4067_v13  ;;  %v822_v41 = vpack.c.bf16 %v801_v40, %v794_v39  ;;  %v821_v45 = vpack.c.bf16 %v800_v44, %v793_v43  ;;  %v4088_v46 = vld [vmem:[%s5570_s28 + $0x148] sm:$0xff]   ;;  %v4090_v48 = vld [vmem:[%s5570_s28 + $0x150] sm:$0xff]   ;;  %v4092_v50 = vld [vmem:[%s5570_s28 + $0x158] sm:$0xff]  }
 0x130   : > { %3561 = vmatprep.subr.bf16.mxu0 %v4070_v16  ;;  %v4089_v47 = vld [vmem:[%s5570_s28 + $0x108] sm:$0xff]   ;;  %v4091_v49 = vld [vmem:[%s5570_s28 + $0x110] sm:$0xff]   ;;  %v4093_v51 = vld [vmem:[%s5570_s28 + $0x118] sm:$0xff]  }
 0x131   : > { %3588 = vmatpush3.bf16.msra.mxu1 %v4069_v15  ;;  %1320 = vmatprep.mubr.bf16.mxu1 %v822_v41  ;;  %v806_v52 = vld [vmem:[%s5091_s2 + $0x78] sm:$0xff]  ;;  %v813_v53 = vld [vmem:[%s5091_s2 + $0xb0] sm:$0xff]  ;;  %v4094_v54 = vld [vmem:[%s5570_s28 + $0x160] sm:$0xff]  }
 0x132   : > { %3589 = vmatprep.subr.bf16.mxu1 %v4072_v18  ;;  %v827_v55 = vpack.c.bf16 %v813_v53, %v806_v52  ;;  %v805_v56 = vld [vmem:[%s5091_s2 + $0x70] sm:$0xff]  ;;  %v812_v57 = vld [vmem:[%s5091_s2 + $0xa8] sm:$0xff]  ;;  %v4095_v58 = vld [vmem:[%s5570_s28 + $0x120] sm:$0xff]  }
 0x133   : > { %3562 = vmatpush3.bf16.msra.mxu0 %v4071_v17  ;;  %v826_v59 = vpack.c.bf16 %v812_v57, %v805_v56  ;;  %v808_v60 = vld [vmem:[%s5091_s2 + $0x88] sm:$0xff]  ;;  %v815_v61 = vld [vmem:[%s5091_s2 + $0xc0] sm:$0xff]  ;;  %v814_v0 = vld [vmem:[%s5091_s2 + $0xb8] sm:$0xff] }
 0x134   : > { %3563 = vmatprep.subr.bf16.mxu0 %v4074_v20  ;;  %v807_v62 = vld [vmem:[%s5091_s2 + $0x80] sm:$0xff]  ;;  %v829_v63 = vpack.c.bf16 %v815_v61, %v808_v60  ;;  %v4096_v1 = vld [vmem:[%s5570_s28 + $0x168] sm:$0xff]   ;;  %v4098_v5 = vld [vmem:[%s5570_s28 + $0x170] sm:$0xff]  }
 0x135   : > { %3590 = vmatpush3.bf16.msra.mxu1 %v4073_v19  ;;  %v828_v2 = vpack.c.bf16 %v814_v0, %v807_v62  ;;  %v4100_v3 = vld [vmem:[%s5570_s28 + $0x180] sm:$0xff]   ;;  %v4097_v4 = vld [vmem:[%s5570_s28 + $0x128] sm:$0xff]   ;;  %v797_v9 = vld [vmem:[%s5091_s2 + $0x30] sm:$0xff] }
 0x136   : > { %3591 = vmatprep.subr.bf16.mxu1 %v4076_v22  ;;  %v796_v6 = vld [vmem:[%s5091_s2 + $0x28] sm:$0xff]  ;;  %v803_v7 = vld [vmem:[%s5091_s2 + $0x60] sm:$0xff]  ;;  %v818_v12 = vld [vmem:[%s5091_s2 + $0xd8] sm:$0xff] }
 0x137   : > { %3564 = vmatpush3.bf16.msra.mxu0 %v4075_v21  ;;  %v824_v8 = vpack.c.bf16 %v803_v7, %v796_v6  ;;  %v804_v10 = vld [vmem:[%s5091_s2 + $0x68] sm:$0xff]  ;;  %v811_v11 = vld [vmem:[%s5091_s2 + $0xa0] sm:$0xff]  ;;  %v4099_v13 = vld [vmem:[%s5570_s28 + $0x130] sm:$0xff]  }
 0x138   : > { %3565 = vmatprep.subr.bf16.mxu0 %v4078_v24  ;;  %v825_v14 = vpack.c.bf16 %v804_v10, %v797_v9  ;;  %v832_v15 = vpack.c.bf16 %v818_v12, %v811_v11  ;;  %v4101_v16 = vld [vmem:[%s5570_s28 + $0x178] sm:$0xff]   ;;  %v795_v18 = vld [vmem:[%s5091_s2 + $0x20] sm:$0xff]  ;;  %v817_v21 = vld [vmem:[%s5091_s2 + $0xd0] sm:$0xff] }
 0x139   : > { %3592 = vmatpush3.bf16.msra.mxu1 %v4077_v23  ;;  %v4102_v17 = vld [vmem:[%s5570_s28 + $0x138] sm:$0xff]   ;;  %v809_v24 = vld [vmem:[%s5091_s2 + $0x90] sm:$0xff]  ;;  %v4107_v31 = vld [vmem:[#allocation5 + $0x20] sm:$0xff]  }
 0x13a   : > { %3593 = vmatprep.subr.bf16.mxu1 %v4080_v26  ;;  %v802_v19 = vld [vmem:[%s5091_s2 + $0x58] sm:$0xff]  ;;  %v4108_v32 = vld [vmem:[#allocation5 + $0x28] sm:$0xff]   ;;  %v4111_v35 = vld [vmem:[#allocation7] sm:$0xff]  }
 0x13b   : > { %3566 = vmatpush3.bf16.msra.mxu0 %v4079_v25  ;;  %v810_v20 = vld [vmem:[%s5091_s2 + $0x98] sm:$0xff]  ;;  %v823_v22 = vpack.c.bf16 %v802_v19, %v795_v18  ;;  %v816_v25 = vld [vmem:[%s5091_s2 + $0xc8] sm:$0xff]  ;;  %s3916_s2 = smul.u32 112, %s779_s26 }
 0x13c   : > { %3567 = vmatprep.subr.bf16.mxu0 %v4082_v28  ;;  %v831_v23 = vpack.c.bf16 %v817_v21, %v810_v20  ;;  %v830_v26 = vpack.c.bf16 %v816_v25, %v809_v24  ;;  %v4104_v28 = vld [vmem:[#allocation5 + $0x8] sm:$0xff]   ;;  %v4109_v33 = vld [vmem:[#allocation5 + $0x30] sm:$0xff]   ;;  %v4115_v39 = vld [vmem:[#allocation7 + $0x20] sm:$0xff]  }
 0x13d   : > { %3594 = vmatpush3.bf16.msra.mxu1 %v4081_v27  ;;  %v4103_v27 = vld [vmem:[#allocation5] sm:$0xff]   ;;  %v4112_v36 = vld [vmem:[#allocation7 + $0x8] sm:$0xff]  }
 0x13e   : > { %3595 = vmatprep.subr.bf16.mxu1 %v4084_v30  ;;  %v4106_v30 = vld [vmem:[#allocation5 + $0x18] sm:$0xff]   ;;  %v4116_v40 = vld [vmem:[#allocation7 + $0x28] sm:$0xff]  }
 0x13f   : > { %3568 = vmatpush3.bf16.msra.mxu0 %v4083_v29  ;;  %v4105_v29 = vld [vmem:[#allocation5 + $0x10] sm:$0xff]  }
 0x140   : > { %3609 = vmatprep.subr.bf16.mxu0 %v4086_v38  ;;  %v4114_v38 = vld [vmem:[#allocation7 + $0x18] sm:$0xff]  }
 0x141   : > { %3596 = vmatpush3.bf16.msra.mxu1 %v4085_v34  ;;  %v4110_v34 = vld [vmem:[#allocation5 + $0x38] sm:$0xff]  }
 0x142   : > { %1272 = vmatmul.mubr.bf16.vlgmr.msra.gmra.mrb[0].mxu0 %v819_v37  ;;  %3730 = vmatprep.subr.bf16.mxu1 %v4100_v3  ;;  %v4113_v37 = vld [vmem:[#allocation7 + $0x10] sm:$0xff]  }
 0x143   : > { %3610 = vmatpush3.bf16.msra.mxu0 %v4087_v42  ;;  %1279 = vmatprep.mubr.bf16.mxu0 %v827_v55  ;;  %v3336_v42 = vld [vmem:[#allocation2] ss:$0 sm:$0xff] }
 0x144   : > { %1321 = vmatmul.mubr.bf16.vlgmr.msra.gmra.mrb[0].mxu1 %v821_v45  ;;  %3611 = vmatprep.subr.bf16.mxu0 %v4088_v46 }
 0x145   : > { %1328 = vmatprep.mubr.bf16.mxu1 %v829_v63  ;;  %3731 = vmatpush3.bf16.msra.mxu1 %v4100_v3 }
 0x146   : > { %3736 = vmatprep.subr.bf16.mxu1 %v4103_v27 }
 0x147   : > { %3612 = vmatpush3.bf16.msra.mxu0 %v4089_v47 }
 0x148   : > { %3613 = vmatprep.subr.bf16.mxu0 %v4090_v48 }
 0x14a   : > { %1280 = vmatmul.mubr.bf16.gmra.mrb[4].mxu0 %v826_v59 }
 0x14b   : > { %3614 = vmatpush3.bf16.msra.mxu0 %v4091_v49  ;;  %1369 = vmatprep.mubr.bf16.mxu0 %v824_v8 }
 0x14c   : > { %3615 = vmatprep.subr.bf16.mxu0 %v4092_v50  ;;  %1329 = vmatmul.mubr.bf16.gmra.mrb[4].mxu1 %v828_v2 }
 0x14d   : > { %3732 = vmatprep.mubr.msk.bf16.mxu1 %vm1232_vm0, %v825_v14 }
 0x14f   : > { %3616 = vmatpush3.bf16.msra.mxu0 %v4093_v51 }
 0x150   : > { %3617 = vmatprep.subr.bf16.mxu0 %v4094_v54 }
 0x153   : > { %3618 = vmatpush3.bf16.msra.mxu0 %v4095_v58 }
 0x154   : > { %3619 = vmatprep.subr.bf16.mxu0 %v4096_v1  ;;  %3733 = vmatmul.mubr.msk.bf16.vlgmr.msra.gmra.mrb[8].mxu1 %vm1232_vm0, %v832_v15 }
 0x155   : > { %3737 = vmatpush3.bf16.msra.mxu1 %v4103_v27 }
 0x156   : > { %3738 = vmatprep.subr.bf16.mxu1 %v4104_v28 }
 0x157   : > { %3620 = vmatpush3.bf16.msra.mxu0 %v4097_v4 }
 0x158   : > { %3621 = vmatprep.subr.bf16.mxu0 %v4098_v5 }
 0x159   : > { %3739 = vmatpush3.bf16.msra.mxu1 %v4104_v28 }
 0x15a   : > { %3740 = vmatprep.subr.bf16.mxu1 %v4105_v29 }
 0x15b   : > { %3622 = vmatpush3.bf16.msra.mxu0 %v4099_v13 }
 0x15c   : > { %3623 = vmatprep.subr.bf16.mxu0 %v4101_v16 }
 0x15d   : > { %3741 = vmatpush3.bf16.msra.mxu1 %v4105_v29 }
 0x15e   : > { %3742 = vmatprep.subr.bf16.mxu1 %v4106_v30 }
 0x15f   : > { %3624 = vmatpush3.bf16.msra.mxu0 %v4102_v17 }
 0x160   : > { %3756 = vmatprep.subr.bf16.mxu0 %v4111_v35 }
 0x161   : > { %3743 = vmatpush3.bf16.msra.mxu1 %v4106_v30 }
 0x162   : > { %1370 = vmatmul.mubr.bf16.vlgmr.msra.gmra.mrb[8].mxu0 %v823_v22  ;;  %3744 = vmatprep.subr.bf16.mxu1 %v4107_v31 }
 0x163   : > { %1377 = vmatprep.mubr.bf16.mxu0 %v831_v23  ;;  %3757 = vmatpush3.bf16.msra.mxu0 %v4111_v35 }
 0x164   : > { %3758 = vmatprep.subr.bf16.mxu0 %v4112_v36 }
 0x165   : > { %3745 = vmatpush3.bf16.msra.mxu1 %v4107_v31 }
 0x166   : > { %3746 = vmatprep.subr.bf16.mxu1 %v4108_v32 }
 0x167   : > { %3759 = vmatpush3.bf16.msra.mxu0 %v4112_v36 }
 0x168   : > { %3760 = vmatprep.subr.bf16.mxu0 %v4113_v37 }
 0x169   : > { %3747 = vmatpush3.bf16.msra.mxu1 %v4108_v32 }
 0x16a   : > { %1378 = vmatmul.mubr.bf16.gmra.mrb[12].mxu0 %v830_v26  ;;  %3748 = vmatprep.subr.bf16.mxu1 %v4109_v33 }
 0x16b   : > { %3761 = vmatpush3.bf16.msra.mxu0 %v4113_v37 }
 0x16c   : > { %3762 = vmatprep.subr.bf16.mxu0 %v4114_v38 }
 0x16d   : > { %3749 = vmatpush3.bf16.msra.mxu1 %v4109_v33 }
 0x16e   : > { %3750 = vmatprep.subr.bf16.mxu1 %v4110_v34 }
 0x16f   : > { %3763 = vmatpush3.bf16.msra.mxu0 %v4114_v38 }
 0x170   : > { %3764 = vmatprep.subr.bf16.mxu0 %v4115_v39 }
 0x171   : > { %3751 = vmatpush3.bf16.msra.mxu1 %v4110_v34 }
 0x173   : > { %3765 = vmatpush3.bf16.msra.mxu0 %v4115_v39 }
 0x174   : > { %3766 = vmatprep.subr.bf16.mxu0 %v4116_v40 }
 0x177   : > { %3767 = vmatpush3.bf16.msra.mxu0 %v4116_v40  ;;  %v4117_v40 = vld [vmem:[#allocation7 + $0x30] sm:$0xff]  }
 0x178   : > { %3768 = vmatprep.subr.bf16.mxu0 %v4117_v40 }
 0x17b   : > { %3769 = vmatpush3.bf16.msra.mxu0 %v4117_v40 }
 0x215   : > { %v3569_v41 = vpop.f32.mrb[0].mxu0 }
 0x216   : > { %v3570_v43 = vpop.f32.mrb[1].mxu0 }
 0x217   : > { %v3571_v44 = vadd.f32 %v3570_v43, %v3569_v41  ;;  %v3572_v45 = vpop.f32.mrb[2].mxu0  ;;  %v3597_v46 = vpop.f32.mrb[0].mxu1  ;;  %v4118_v41 = vld [vmem:[#allocation7 + $0x38] sm:$0xff]   ;;  %v4120_v43 = vld [vmem:[#allocation8 + $0x8] sm:$0xff]  }
 0x218   : > { %v3573_v47 = vpop.f32.mrb[3].mxu0  ;;  %v3598_v50 = vpop.f32.mrb[1].mxu1  ;;  %3770 = vmatprep.subr.bf16.mxu0 %v4118_v41 }
 0x219   : > { %v1274_v48 = vadd.f32 %v3571_v44, %v3336_v42  ;;  %v3574_v49 = vadd.f32 %v3573_v47, %v3572_v45  ;;  %v3599_v51 = vadd.f32 %v3598_v50, %v3597_v46  ;;  %v3600_v52 = vpop.f32.mrb[2].mxu1  ;;  %3771 = vmatpush3.bf16.msra.mxu0 %v4118_v41  ;;  %v4121_v44 = vld [vmem:[#allocation8 + $0x10] sm:$0xff]   ;;  %v4122_v45 = vld [vmem:[#allocation8 + $0x18] sm:$0xff]   ;;  %v4123_v46 = vld [vmem:[#allocation8 + $0x20] sm:$0xff]  }
 0x21a   : > { %v3601_v54 = vpop.f32.mrb[3].mxu1  ;;  %v4124_v47 = vld [vmem:[#allocation8 + $0x28] sm:$0xff]  }
 0x21b   : > { %v1277_v53 = vadd.f32 %v3574_v49, %v3336_v42  ;;  %v1323_v55 = vadd.f32 %v3599_v51, %v1274_v48  ;;  %v3602_v56 = vadd.f32 %v3601_v54, %v3600_v52  ;;  %v3388_v48 = vld [vmem:[%s5572_s4] ss:$0 sm:$0xff]  ;;  %s3918_s4 = smul.u32 1792, %s4729_s3  ;;  %s5442_s3 = scalar_lea.sflag [#allocation4], %s779_s26 }
 0x21d   : > { %v1326_v57 = vadd.f32 %v3602_v56, %v1277_v53  ;;  %v3575_v58 = vpop.f32.mrb[4].mxu0 }
 0x21e   : > { %v3576_v59 = vpop.f32.mrb[5].mxu0 }
 0x21f   : > { %v3577_v60 = vadd.f32 %v3576_v59, %v3575_v58  ;;  %v3578_v61 = vpop.f32.mrb[6].mxu0  ;;  %v3603_v62 = vpop.f32.mrb[4].mxu1 }
 0x220   : > { %v3579_v63 = vpop.f32.mrb[7].mxu0  ;;  %v3604_v0 = vpop.f32.mrb[5].mxu1 }
 0x221   : > { %v1282_v1 = vadd.f32 %v3577_v60, %v3336_v42  ;;  %v3580_v2 = vadd.f32 %v3579_v63, %v3578_v61  ;;  %v3605_v3 = vadd.f32 %v3604_v0, %v3603_v62  ;;  %v3606_v4 = vpop.f32.mrb[6].mxu1  ;;  %v4125_v63 = vld [vmem:[#allocation8 + $0x30] sm:$0xff]   ;;  %v4126_v0 = vld [vmem:[#allocation8 + $0x38] sm:$0xff]  }
 0x222   : > { %v3607_v5 = vpop.f32.mrb[7].mxu1 }
 0x223   : > { %v1285_v6 = vadd.f32 %v3580_v2, %v3336_v42  ;;  %v1331_v7 = vadd.f32 %v3605_v3, %v1282_v1  ;;  %v3608_v8 = vadd.f32 %v3607_v5, %v3606_v4  ;;  %v4119_v42 = vld [vmem:[#allocation8] sm:$0xff]   ;;  %v4128_v2 = vld [vmem:[#allocation10 + $0x8] sm:$0xff]   ;;  %v4129_v3 = vld [vmem:[#allocation10 + $0x10] sm:$0xff]  }
 0x224   : > { %3776 = vmatprep.subr.bf16.mxu1 %v4119_v42  ;;  %v4127_v1 = vld [vmem:[#allocation10] sm:$0xff]   ;;  %v4130_v4 = vld [vmem:[#allocation10 + $0x18] sm:$0xff]  }
 0x225   : > { %v1334_v9 = vadd.f32 %v3608_v8, %v1285_v6  ;;  %3796 = vmatprep.subr.bf16.mxu0 %v4127_v1  ;;  %v4131_v5 = vld [vmem:[#allocation10 + $0x20] sm:$0xff]   ;;  %v4132_v6 = vld [vmem:[#allocation10 + $0x28] sm:$0xff]  }
 0x227   : > { %v3734_v10 = vpop.f32.mrb[8].mxu1 }
 0x228   : > { %v1420_v11 = vpop.f32.mrb[9].mxu1 }
 0x229   : > { %v3735_v12 = vpop.f32.mrb[10].mxu1 }
 0x22a   : > { %v1423_v13 = vpop.f32.mrb[11].mxu1 }
 0x235   : > { %v3625_v14 = vpop.f32.mrb[8].mxu0 }
 0x236   : > { %v3626_v15 = vpop.f32.mrb[9].mxu0 }
 0x237   : > { %v3627_v16 = vadd.f32 %v3626_v15, %v3625_v14  ;;  %v3628_v17 = vpop.f32.mrb[10].mxu0 }
 0x238   : > { %v3629_v18 = vpop.f32.mrb[11].mxu0 }
 0x239   : > { %v3630_v19 = vadd.f32 %v3629_v18, %v3628_v17  ;;  %v1372_v20 = vadd.f32 %v3627_v16, %v1323_v55 }
 0x23b   : > { %v1421_v21 = vadd.f32 %v1420_v11, %v1372_v20  ;;  %v1375_v22 = vadd.f32 %v3630_v19, %v1326_v57 }
 0x23d   : > { %v1424_v23 = vadd.f32 %v1423_v13, %v1375_v22  ;;  %v3631_v24 = vpop.f32.mrb[12].mxu0  ;;  %v1435_v26 = vmax.f32 %v1421_v21, 0.0  ;;  %v4133_v22 = vld [vmem:[#allocation10 + $0x30] sm:$0xff]  }
 0x23e   : > { %v3632_v25 = vpop.f32.mrb[13].mxu0 }
 0x23f   : > { %v1436_v27 = vmax.f32 %v1424_v23, 0.0  ;;  %v3633_v28 = vadd.f32 %v3632_v25, %v3631_v24  ;;  %v3634_v29 = vpop.f32.mrb[14].mxu0  ;;  %v4134_v23 = vld [vmem:[#allocation10 + $0x38] sm:$0xff]   ;;  %v4135_v24 = vld [vmem:[#allocation11] sm:$0xff]   ;;  %v4136_v25 = vld [vmem:[#allocation11 + $0x8] sm:$0xff]  }
 0x240   : > { %v3635_v30 = vpop.f32.mrb[15].mxu0 }
 0x241   : > { %v1439_v31 = vpack.c.bf16 %v1436_v27, %v1435_v26  ;;  %v1380_v32 = vadd.f32 %v3633_v28, %v1331_v7  ;;  %v3636_v33 = vadd.f32 %v3635_v30, %v3634_v29  ;;  %v3397_v7 = vld [vmem:[%s5489_s6] ss:$0 sm:$0xff]  ;;  %v4137_v26 = vld [vmem:[#allocation11 + $0x10] sm:$0xff]   ;;  %v4139_v28 = vld [vmem:[#allocation11 + $0x20] sm:$0xff]  }
 0x242   : > { %v4138_v27 = vld [vmem:[#allocation11 + $0x18] sm:$0xff]   ;;  %v4140_v29 = vld [vmem:[#allocation11 + $0x28] sm:$0xff]  }
 0x243   : > { %v1429_v34 = vadd.f32 %v3734_v10, %v1380_v32  ;;  %v1383_v35 = vadd.f32 %v3636_v33, %v1334_v9  ;;  %3752 = vmatprep.mubr.bf16.mxu1 %v1439_v31  ;;  %v3406_v30 = vld [vmem:[%s5491_s8] ss:$0 sm:$0xff] }
 0x245   : > { %v1432_v36 = vadd.f32 %v3735_v12, %v1383_v35  ;;  %v1437_v37 = vmax.f32 %v1429_v34, 0.0 }
 0x247   : > { %v1438_v38 = vmax.f32 %v1432_v36, 0.0 }
 0x249   : > { %v1440_v39 = vpack.c.bf16 %v1438_v38, %v1437_v37 }
 0x24b   : > { %3753 = vmatmul.mubr.bf16.vlgmr.msra.gmra.mrb[12].mxu1 %v1440_v39 }
 0x24c   : > { %3777 = vmatpush3.bf16.msra.mxu1 %v4119_v42 }
 0x24d   : > { %3778 = vmatprep.subr.bf16.mxu1 %v4120_v43 }
 0x250   : > { %3779 = vmatpush3.bf16.msra.mxu1 %v4120_v43 }
 0x251   : > { %3780 = vmatprep.subr.bf16.mxu1 %v4121_v44 }
 0x254   : > { %3781 = vmatpush3.bf16.msra.mxu1 %v4121_v44 }
 0x255   : > { %3782 = vmatprep.subr.bf16.mxu1 %v4122_v45 }
 0x258   : > { %3783 = vmatpush3.bf16.msra.mxu1 %v4122_v45  ;;  %v4141_v45 = vld [vmem:[#allocation11 + $0x30] sm:$0xff]  }
 0x259   : > { %3784 = vmatprep.subr.bf16.mxu1 %v4123_v46 }
 0x25c   : > { %3785 = vmatpush3.bf16.msra.mxu1 %v4123_v46  ;;  %v4142_v46 = vld [vmem:[#allocation11 + $0x38] sm:$0xff]  }
 0x25d   : > { %3786 = vmatprep.subr.bf16.mxu1 %v4124_v47 }
 0x260   : > { %3787 = vmatpush3.bf16.msra.mxu1 %v4124_v47  ;;  %v4143_v47 = vld [vmem:[#allocation13] sm:$0xff]  }
 0x261   : > { %3788 = vmatprep.subr.bf16.mxu1 %v4125_v63 }
 0x264   : > { %3789 = vmatpush3.bf16.msra.mxu1 %v4125_v63 }
 0x265   : > { %3790 = vmatprep.subr.bf16.mxu1 %v4126_v0 }
 0x268   : > { %3791 = vmatpush3.bf16.msra.mxu1 %v4126_v0  ;;  %v4149_v0 = vld [vmem:[#allocation13 + $0x30] sm:$0xff]  }
 0x269   : > { %3816 = vmatprep.subr.bf16.mxu1 %v4135_v24 }
 0x31e   : > { %v3754_v49 = vpop.f32.mrb[12].mxu1 }
 0x31f   : > { %v1555_v50 = vadd.f32 %v3754_v49, %v3388_v48  ;;  %v1546_v51 = vpop.f32.mrb[13].mxu1  ;;  %v4145_v49 = vld [vmem:[#allocation13 + $0x10] sm:$0xff]  }
 0x320   : > { %v1547_v52 = vadd.f32 %v3388_v48, %v1546_v51  ;;  %v3755_v53 = vpop.f32.mrb[14].mxu1  ;;  %v4147_v51 = vld [vmem:[#allocation13 + $0x20] sm:$0xff]  }
 0x321   : > { %v1558_v54 = vadd.f32 %v3755_v53, %v3388_v48  ;;  %v1549_v55 = vpop.f32.mrb[15].mxu1  ;;  %v1563_v57 = vmax.f32 %v1555_v50, 0.0  ;;  %v4146_v50 = vld [vmem:[#allocation13 + $0x18] sm:$0xff]  }
 0x322   : > { %v1550_v56 = vadd.f32 %v3388_v48, %v1549_v55  ;;  %v1561_v59 = vmax.f32 %v1547_v52, 0.0  ;;  %v4144_v48 = vld [vmem:[#allocation13 + $0x8] sm:$0xff]  }
 0x323   : > { %v1564_v58 = vmax.f32 %v1558_v54, 0.0  ;;  %v4148_v52 = vld [vmem:[#allocation13 + $0x28] sm:$0xff]   ;;  %v3415_v54 = vld [vmem:[%s5493_s10] ss:$0 sm:$0xff] }
 0x324   : > { %v1562_v60 = vmax.f32 %v1550_v56, 0.0 }
 0x325   : > { %v1566_v61 = vpack.c.bf16 %v1564_v58, %v1563_v57 }
 0x326   : > { %v1565_v62 = vpack.c.bf16 %v1562_v60, %v1561_v59 }
 0x328   : > { %3772 = vmatprep.mubr.bf16.mxu0 %v1565_v62 }
 0x329   : > { %3773 = vmatmul.mubr.bf16.vlgmr.msra.gmra.mrb[16].mxu0 %v1566_v61 }
 0x32a   : > { %3797 = vmatpush3.bf16.msra.mxu0 %v4127_v1  ;;  %v4150_v1 = vld [vmem:[#allocation13 + $0x38] sm:$0xff]  }
 0x32b   : > { %3798 = vmatprep.subr.bf16.mxu0 %v4128_v2 }
 0x32e   : > { %3799 = vmatpush3.bf16.msra.mxu0 %v4128_v2  ;;  %v4151_v2 = vld [vmem:[#allocation14] sm:$0xff]  }
 0x32f   : > { %3800 = vmatprep.subr.bf16.mxu0 %v4129_v3 }
 0x332   : > { %3801 = vmatpush3.bf16.msra.mxu0 %v4129_v3  ;;  %v4152_v3 = vld [vmem:[#allocation14 + $0x8] sm:$0xff]  }
 0x333   : > { %3802 = vmatprep.subr.bf16.mxu0 %v4130_v4 }
 0x336   : > { %3803 = vmatpush3.bf16.msra.mxu0 %v4130_v4  ;;  %v4153_v4 = vld [vmem:[#allocation14 + $0x10] sm:$0xff]  }
 0x337   : > { %3804 = vmatprep.subr.bf16.mxu0 %v4131_v5 }
 0x33a   : > { %3805 = vmatpush3.bf16.msra.mxu0 %v4131_v5  ;;  %v4154_v5 = vld [vmem:[#allocation14 + $0x18] sm:$0xff]  }
 0x33b   : > { %3806 = vmatprep.subr.bf16.mxu0 %v4132_v6 }
 0x33e   : > { %3807 = vmatpush3.bf16.msra.mxu0 %v4132_v6  ;;  %v4155_v6 = vld [vmem:[#allocation14 + $0x20] sm:$0xff]  }
 0x33f   : > { %3808 = vmatprep.subr.bf16.mxu0 %v4133_v22 }
 0x342   : > { %3809 = vmatpush3.bf16.msra.mxu0 %v4133_v22 }
 0x343   : > { %3810 = vmatprep.subr.bf16.mxu0 %v4134_v23 }
 0x346   : > { %3811 = vmatpush3.bf16.msra.mxu0 %v4134_v23  ;;  %v4157_v23 = vld [vmem:[#allocation14 + $0x30] sm:$0xff]  }
 0x347   : > { %3836 = vmatprep.subr.bf16.mxu0 %v4143_v47 }
 0x3fc   : > { %v3774_v8 = vpop.f32.mrb[16].mxu0 }
 0x3fd   : > { %v1681_v9 = vadd.f32 %v3774_v8, %v3397_v7  ;;  %v1672_v10 = vpop.f32.mrb[17].mxu0  ;;  %v3424_v8 = vld [vmem:[%s5495_s12] ss:$0 sm:$0xff] }
 0x3fe   : > { %v1673_v11 = vadd.f32 %v3397_v7, %v1672_v10  ;;  %v3775_v12 = vpop.f32.mrb[18].mxu0 }
 0x3ff   : > { %v1684_v13 = vadd.f32 %v3775_v12, %v3397_v7  ;;  %v1675_v14 = vpop.f32.mrb[19].mxu0  ;;  %v1689_v16 = vmax.f32 %v1681_v9, 0.0 }
 0x400   : > { %v1676_v15 = vadd.f32 %v3397_v7, %v1675_v14  ;;  %v1687_v18 = vmax.f32 %v1673_v11, 0.0  ;;  %v4156_v7 = vld [vmem:[#allocation14 + $0x28] sm:$0xff]  }
 0x401   : > { %v1690_v17 = vmax.f32 %v1684_v13, 0.0 }
 0x402   : > { %v1688_v19 = vmax.f32 %v1676_v15, 0.0 }
 0x403   : > { %v1692_v20 = vpack.c.bf16 %v1690_v17, %v1689_v16 }
 0x404   : > { %v1691_v21 = vpack.c.bf16 %v1688_v19, %v1687_v18 }
 0x406   : > { %3792 = vmatprep.mubr.bf16.mxu1 %v1691_v21 }
 0x407   : > { %3793 = vmatmul.mubr.bf16.vlgmr.msra.gmra.mrb[16].mxu1 %v1692_v20 }
 0x408   : > { %3817 = vmatpush3.bf16.msra.mxu1 %v4135_v24  ;;  %v4158_v24 = vld [vmem:[#allocation14 + $0x38] sm:$0xff]  }
 0x409   : > { %3818 = vmatprep.subr.bf16.mxu1 %v4136_v25 }
 0x40c   : > { %3819 = vmatpush3.bf16.msra.mxu1 %v4136_v25  ;;  %v4159_v25 = vld [vmem:[#allocation16] sm:$0xff]  }
 0x40d   : > { %3820 = vmatprep.subr.bf16.mxu1 %v4137_v26 }
 0x410   : > { %3821 = vmatpush3.bf16.msra.mxu1 %v4137_v26  ;;  %v4160_v26 = vld [vmem:[#allocation16 + $0x8] sm:$0xff]  }
 0x411   : > { %3822 = vmatprep.subr.bf16.mxu1 %v4138_v27 }
 0x414   : > { %3823 = vmatpush3.bf16.msra.mxu1 %v4138_v27  ;;  %v4161_v27 = vld [vmem:[#allocation16 + $0x10] sm:$0xff]  }
 0x415   : > { %3824 = vmatprep.subr.bf16.mxu1 %v4139_v28 }
 0x418   : > { %3825 = vmatpush3.bf16.msra.mxu1 %v4139_v28  ;;  %v4162_v28 = vld [vmem:[#allocation16 + $0x18] sm:$0xff]  }
 0x419   : > { %3826 = vmatprep.subr.bf16.mxu1 %v4140_v29 }
 0x41c   : > { %3827 = vmatpush3.bf16.msra.mxu1 %v4140_v29  ;;  %v4163_v29 = vld [vmem:[#allocation16 + $0x20] sm:$0xff]  }
 0x41d   : > { %3828 = vmatprep.subr.bf16.mxu1 %v4141_v45 }
 0x420   : > { %3829 = vmatpush3.bf16.msra.mxu1 %v4141_v45 }
 0x421   : > { %3830 = vmatprep.subr.bf16.mxu1 %v4142_v46 }
 0x424   : > { %3831 = vmatpush3.bf16.msra.mxu1 %v4142_v46  ;;  %v4165_v46 = vld [vmem:[#allocation16 + $0x30] sm:$0xff]  }
 0x425   : > { %3856 = vmatprep.subr.bf16.mxu1 %v4151_v2 }
 0x4da   : > { %v3794_v31 = vpop.f32.mrb[16].mxu1 }
 0x4db   : > { %v1807_v32 = vadd.f32 %v3794_v31, %v3406_v30  ;;  %v1798_v33 = vpop.f32.mrb[17].mxu1  ;;  %v3433_v31 = vld [vmem:[%s5497_s14] ss:$0 sm:$0xff] }
 0x4dc   : > { %v1799_v34 = vadd.f32 %v3406_v30, %v1798_v33  ;;  %v3795_v35 = vpop.f32.mrb[18].mxu1 }
 0x4dd   : > { %v1810_v36 = vadd.f32 %v3795_v35, %v3406_v30  ;;  %v1801_v37 = vpop.f32.mrb[19].mxu1  ;;  %v1815_v39 = vmax.f32 %v1807_v32, 0.0 }
 0x4de   : > { %v1802_v38 = vadd.f32 %v3406_v30, %v1801_v37  ;;  %v1813_v41 = vmax.f32 %v1799_v34, 0.0  ;;  %v4164_v30 = vld [vmem:[#allocation16 + $0x28] sm:$0xff]  }
 0x4df   : > { %v1816_v40 = vmax.f32 %v1810_v36, 0.0 }
 0x4e0   : > { %v1814_v42 = vmax.f32 %v1802_v38, 0.0 }
 0x4e1   : > { %v1818_v43 = vpack.c.bf16 %v1816_v40, %v1815_v39 }
 0x4e2   : > { %v1817_v44 = vpack.c.bf16 %v1814_v42, %v1813_v41 }
 0x4e4   : > { %3812 = vmatprep.mubr.bf16.mxu0 %v1817_v44 }
 0x4e5   : > { %3813 = vmatmul.mubr.bf16.vlgmr.msra.gmra.mrb[20].mxu0 %v1818_v43 }
 0x4e6   : > { %3837 = vmatpush3.bf16.msra.mxu0 %v4143_v47  ;;  %v4166_v47 = vld [vmem:[#allocation16 + $0x38] sm:$0xff]  }
 0x4e7   : > { %3838 = vmatprep.subr.bf16.mxu0 %v4144_v48 }
 0x4ea   : > { %3839 = vmatpush3.bf16.msra.mxu0 %v4144_v48  ;;  %v4167_v48 = vld [vmem:[%s5502_s19] ss:$28 sps:$4 sm:$0xff]  }
 0x4eb   : > { %3840 = vmatprep.subr.bf16.mxu0 %v4145_v49 }
 0x4ee   : > { %3841 = vmatpush3.bf16.msra.mxu0 %v4145_v49  ;;  %v4169_v49 = vld [vmem:[%s5502_s19 + $0x4] ss:$28 sps:$4 sm:$0xff]  }
 0x4ef   : > { %3842 = vmatprep.subr.bf16.mxu0 %v4146_v50 }
 0x4f2   : > { %3843 = vmatpush3.bf16.msra.mxu0 %v4146_v50  ;;  %v4172_v50 = vld [vmem:[%s5502_s19 + $0xc] ss:$28 sps:$4 sm:$0xff]  }
 0x4f3   : > { %3844 = vmatprep.subr.bf16.mxu0 %v4147_v51 }
 0x4f6   : > { %3845 = vmatpush3.bf16.msra.mxu0 %v4147_v51  ;;  %v4175_v51 = vld [vmem:[%s5502_s19 + $0x3c] ss:$28 sps:$4 sm:$0xff]  }
 0x4f7   : > { %3846 = vmatprep.subr.bf16.mxu0 %v4148_v52 }
 0x4fa   : > { %3847 = vmatpush3.bf16.msra.mxu0 %v4148_v52  ;;  %v4173_v52 = vld [vmem:[%s5502_s19 + $0x38] ss:$28 sps:$4 sm:$0xff]  }
 0x4fb   : > { %3848 = vmatprep.subr.bf16.mxu0 %v4149_v0 }
 0x4fe   : > { %3849 = vmatpush3.bf16.msra.mxu0 %v4149_v0 }
 0x4ff   : > { %3850 = vmatprep.subr.bf16.mxu0 %v4150_v1 }
 0x502   : > { %3851 = vmatpush3.bf16.msra.mxu0 %v4150_v1 }
 0x503   : > { %3876 = vmatprep.subr.bf16.mxu0 %v4159_v25 }
 0x5b8   : > { %v3814_v53 = vpop.f32.mrb[20].mxu0 }
 0x5b9   : > { %v1924_v55 = vpop.f32.mrb[21].mxu0  ;;  %v1933_v57 = vadd.f32 %v3814_v53, %v3415_v54  ;;  %v4181_v53 = vld [vmem:[%s5502_s19 + $0x74] ss:$28 sps:$4 sm:$0xff]  }
 0x5ba   : > { %v3815_v56 = vpop.f32.mrb[22].mxu0  ;;  %v1925_v60 = vadd.f32 %v3415_v54, %v1924_v55  ;;  %v4187_v55 = vld [vmem:[%s5502_s19 + $0xac] ss:$28 sps:$4 sm:$0xff]  }
 0x5bb   : > { %v1936_v58 = vadd.f32 %v3815_v56, %v3415_v54  ;;  %v1927_v59 = vpop.f32.mrb[23].mxu0  ;;  %v4185_v56 = vld [vmem:[%s5502_s19 + $0xa8] ss:$28 sps:$4 sm:$0xff]  }
 0x5bc   : > { %v1928_v61 = vadd.f32 %v3415_v54, %v1927_v59  ;;  %v4179_v54 = vld [vmem:[%s5502_s19 + $0x70] ss:$28 sps:$4 sm:$0xff]   ;;  %v4199_v59 = vld [vmem:[%s5502_s19 + $0x11c] ss:$28 sps:$4 sm:$0xff]  }
 0x5bd   : > { %v1940_v62 = vpack.c.bf16 %v1936_v58, %v1933_v57  ;;  %v4193_v57 = vld [vmem:[%s5502_s19 + $0xe4] ss:$28 sps:$4 sm:$0xff]  }
 0x5be   : > { %v1939_v63 = vpack.c.bf16 %v1928_v61, %v1925_v60  ;;  %v4191_v58 = vld [vmem:[%s5502_s19 + $0xe0] ss:$28 sps:$4 sm:$0xff]   ;;  %v4197_v60 = vld [vmem:[%s5502_s19 + $0x118] ss:$28 sps:$4 sm:$0xff]  }
 0x5bf   : > { %v3442_v61 = vld [vmem:[%s5573_s20] ss:$0 sm:$0xff]  ;;  %s5578_s20 = sld [smem:[#allocation42_spill]] }
 0x5c0   : > { %3832 = vmatprep.mubr.bf16.mxu1 %v1939_v63 }
 0x5c1   : > { %3833 = vmatmul.mubr.bf16.vlgmr.msra.gmra.mrb[20].mxu1 %v1940_v62 }
 0x5c2   : > { %3857 = vmatpush3.bf16.msra.mxu1 %v4151_v2 }
 0x5c3   : > { %3858 = vmatprep.subr.bf16.mxu1 %v4152_v3 }
 0x5c5   : > { %s5434_s29 = scalar_lea.hbm %s5578_s20, %s3918_s4 }
 0x5c6   : > { %3859 = vmatpush3.bf16.msra.mxu1 %v4152_v3 }
 0x5c7   : > { %3860 = vmatprep.subr.bf16.mxu1 %v4153_v4 }
 0x5ca   : > { %3861 = vmatpush3.bf16.msra.mxu1 %v4153_v4 }
 0x5cb   : > { %3862 = vmatprep.subr.bf16.mxu1 %v4154_v5 }
 0x5ce   : > { %3863 = vmatpush3.bf16.msra.mxu1 %v4154_v5 }
 0x5cf   : > { %3864 = vmatprep.subr.bf16.mxu1 %v4155_v6 }
 0x5d2   : > { %3865 = vmatpush3.bf16.msra.mxu1 %v4155_v6 }
 0x5d3   : > { %3866 = vmatprep.subr.bf16.mxu1 %v4156_v7 }
 0x5d6   : > { %3867 = vmatpush3.bf16.msra.mxu1 %v4156_v7 }
 0x5d7   : > { %3868 = vmatprep.subr.bf16.mxu1 %v4157_v23 }
 0x5da   : > { %3869 = vmatpush3.bf16.msra.mxu1 %v4157_v23  ;;  %v4205_v23 = vld [vmem:[%s5502_s19 + $0x154] ss:$28 sps:$4 sm:$0xff]  }
 0x5db   : > { %3870 = vmatprep.subr.bf16.mxu1 %v4158_v24 }
 0x5de   : > { %3871 = vmatpush3.bf16.msra.mxu1 %v4158_v24  ;;  %v4208_v24 = vld [vmem:[%s5502_s19 + $0x15c] ss:$28 sps:$4 sm:$0xff]  }
 0x5df   : > { %2834 = vmatprep.subr.bf16.mxu1 %v4169_v49 }
 0x694   : > { %v3834_v9 = vpop.f32.mrb[20].mxu1 }
 0x695   : > { %v2055_v10 = vadd.f32 %v3834_v9, %v3424_v8  ;;  %v2046_v11 = vpop.f32.mrb[21].mxu1 }
 0x696   : > { %v2047_v12 = vadd.f32 %v3424_v8, %v2046_v11  ;;  %v3835_v13 = vpop.f32.mrb[22].mxu1 }
 0x697   : > { %v2058_v14 = vadd.f32 %v3835_v13, %v3424_v8  ;;  %v2049_v15 = vpop.f32.mrb[23].mxu1  ;;  %v2063_v17 = vmax.f32 %v2055_v10, 0.0  ;;  %v4178_v13 = vld [vmem:[%s5502_s19 + $0x44] ss:$28 sps:$4 sm:$0xff]  }
 0x698   : > { %v2050_v16 = vadd.f32 %v3424_v8, %v2049_v15  ;;  %v2061_v19 = vmax.f32 %v2047_v12, 0.0  ;;  %v4170_v12 = vld [vmem:[%s5502_s19 + $0x8] ss:$28 sps:$4 sm:$0xff]   ;;  %v4184_v15 = vld [vmem:[%s5502_s19 + $0x7c] ss:$28 sps:$4 sm:$0xff]  }
 0x699   : > { %v2064_v18 = vmax.f32 %v2058_v14, 0.0  ;;  %v4176_v14 = vld [vmem:[%s5502_s19 + $0x40] ss:$28 sps:$4 sm:$0xff]  }
 0x69a   : > { %v2062_v20 = vmax.f32 %v2050_v16, 0.0  ;;  %v4182_v16 = vld [vmem:[%s5502_s19 + $0x78] ss:$28 sps:$4 sm:$0xff]  }
 0x69b   : > { %v2066_v21 = vpack.c.bf16 %v2064_v18, %v2063_v17  ;;  %v4190_v17 = vld [vmem:[%s5502_s19 + $0xb4] ss:$28 sps:$4 sm:$0xff]  }
 0x69c   : > { %v2065_v22 = vpack.c.bf16 %v2062_v20, %v2061_v19  ;;  %v4188_v18 = vld [vmem:[%s5502_s19 + $0xb0] ss:$28 sps:$4 sm:$0xff]   ;;  %v4194_v20 = vld [vmem:[%s5502_s19 + $0xe8] ss:$28 sps:$4 sm:$0xff]  }
 0x69d   : > { %v4196_v19 = vld [vmem:[%s5502_s19 + $0xec] ss:$28 sps:$4 sm:$0xff]  }
 0x69e   : > { %3852 = vmatprep.mubr.bf16.mxu0 %v2065_v22  ;;  %v4200_v22 = vld [vmem:[%s5502_s19 + $0x120] ss:$28 sps:$4 sm:$0xff]  }
 0x69f   : > { %3853 = vmatmul.mubr.bf16.vlgmr.msra.gmra.mrb[24].mxu0 %v2066_v21  ;;  %v4202_v21 = vld [vmem:[%s5502_s19 + $0x124] ss:$28 sps:$4 sm:$0xff]  }
 0x6a0   : > { %3877 = vmatpush3.bf16.msra.mxu0 %v4159_v25  ;;  %v4203_v25 = vld [vmem:[%s5502_s19 + $0x150] ss:$28 sps:$4 sm:$0xff]  }
 0x6a1   : > { %3878 = vmatprep.subr.bf16.mxu0 %v4160_v26 }
 0x6a4   : > { %3879 = vmatpush3.bf16.msra.mxu0 %v4160_v26  ;;  %v4206_v26 = vld [vmem:[%s5502_s19 + $0x158] ss:$28 sps:$4 sm:$0xff]  }
 0x6a5   : > { %3880 = vmatprep.subr.bf16.mxu0 %v4161_v27 }
 0x6a8   : > { %3881 = vmatpush3.bf16.msra.mxu0 %v4161_v27  ;;  %v4211_v27 = vld [vmem:[%s5502_s19 + $0x18c] ss:$28 sps:$4 sm:$0xff]  }
 0x6a9   : > { %3882 = vmatprep.subr.bf16.mxu0 %v4162_v28 }
 0x6ac   : > { %3883 = vmatpush3.bf16.msra.mxu0 %v4162_v28  ;;  %v4214_v28 = vld [vmem:[%s5502_s19 + $0x194] ss:$28 sps:$4 sm:$0xff]  }
 0x6ad   : > { %3884 = vmatprep.subr.bf16.mxu0 %v4163_v29 }
 0x6b0   : > { %3885 = vmatpush3.bf16.msra.mxu0 %v4163_v29  ;;  %v4209_v29 = vld [vmem:[%s5502_s19 + $0x188] ss:$28 sps:$4 sm:$0xff]  }
 0x6b1   : > { %3886 = vmatprep.subr.bf16.mxu0 %v4164_v30 }
 0x6b4   : > { %3887 = vmatpush3.bf16.msra.mxu0 %v4164_v30  ;;  %v4212_v30 = vld [vmem:[%s5502_s19 + $0x190] ss:$28 sps:$4 sm:$0xff]  }
 0x6b5   : > { %3888 = vmatprep.subr.bf16.mxu0 %v4165_v46 }
 0x6b8   : > { %3889 = vmatpush3.bf16.msra.mxu0 %v4165_v46 }
 0x6b9   : > { %3890 = vmatprep.subr.bf16.mxu0 %v4166_v47 }
 0x6bc   : > { %3891 = vmatpush3.bf16.msra.mxu0 %v4166_v47 }
 0x6bd   : > { %2887 = vmatprep.subr.bf16.mxu0 %v4172_v50  ;;  %v4221_v50 = vld [vmem:[%s5502_s19 + $0x4c] ss:$28 sps:$4 sm:$0xff]  }
 0x772   : > { %v3854_v32 = vpop.f32.mrb[24].mxu0 }
 0x773   : > { %v2181_v33 = vadd.f32 %v3854_v32, %v3433_v31  ;;  %v2172_v34 = vpop.f32.mrb[25].mxu0  ;;  %v4594_v32 = vmov 0  }
 0x774   : > { %v2173_v35 = vadd.f32 %v3433_v31, %v2172_v34  ;;  %v3855_v36 = vpop.f32.mrb[26].mxu0  ;;  %v3451_v34 = vld [vmem:[%s5574_s7] ss:$0 sm:$0xff]  ;;  %s5403_s7 = scalar_lea.vmem [#allocation17], %s3916_s2 }
 0x775   : > { %v2184_v37 = vadd.f32 %v3855_v36, %v3433_v31  ;;  %v2175_v38 = vpop.f32.mrb[27].mxu0  ;;  %v2189_v40 = vmax.f32 %v2181_v33, 0.0  ;;  %v4218_v33 = vld [vmem:[%s5502_s19 + $0x18] ss:$28 sps:$4 sm:$0xff]   ;;  %s3162_s0 = sshll.u32 %s5403_s7, 4  ;;  %s5436_s0 = int_to_ptr.vmem [resolvable:$true] %s3162_s0 }
 0x776   : > { %v2176_v39 = vadd.f32 %v3433_v31, %v2175_v38  ;;  %v2187_v42 = vmax.f32 %v2173_v35, 0.0  ;;  %v4217_v31 = vld [vmem:[%s5502_s19 + $0x14] ss:$28 sps:$4 sm:$0xff]   ;;  %s4499_s25 = scalar_lea.vmem %s5436_s0, 1792  ;;  %p4506_p10 = scmp.lt.s32.totalorder %s5436_s0, %s4504_s30 }
 0x777   : > { %v2190_v41 = vmax.f32 %v2184_v37, 0.0  ;;  %p4500_p6 = scmp.ne.s32.totalorder %s5436_s0, %s4499_s25  ;;  %p4507_p2 = scmp.lt.s32.totalorder %s4505_s23, %s4499_s25 }
 0x778   : > { %v2188_v43 = vmax.f32 %v2176_v39, 0.0 }
 0x779   : > { %v2192_v44 = vpack.c.bf16 %v2190_v41, %v2189_v40  ;;  %p4501_p5 = pnand %p4500_p6, %p5579_p9  ;;  %p4508_p3 = por %p4507_p2, %p4506_p10 }
 0x77a   : > { %v2191_v45 = vpack.c.bf16 %v2188_v43, %v2187_v42 }
 0x77b   : > { %p4502_p0 = pneg %p4501_p5 }
 0x77c   : > { %3872 = vmatprep.mubr.bf16.mxu1 %v2191_v45 }
 0x77d   : > { %3873 = vmatmul.mubr.bf16.vlgmr.msra.gmra.mrb[24].mxu1 %v2192_v44  ;;  %p4509_p4 = pnand %p4508_p3, %p4502_p0 }
 0x77e   : > { %2835 = vmatpush1.bf16.msra.mxu1 %v4167_v48  ;;  %2866 = vmatprep.mubr.bf16.mxu1 %v4594_v32  ;;  %v4215_v48 = vld [vmem:[%s5502_s19 + $0x10] ss:$28 sps:$4 sm:$0xff]  }
 0x77f   : > { %2836 = vmatprep.subr.bf16.mxu1 %v4175_v51  ;;  %v4222_v51 = vld [vmem:[%s5502_s19 + $0x50] ss:$28 sps:$4 sm:$0xff]  }
 0x782   : > { %2837 = vmatpush1.bf16.msra.mxu1 %v4173_v52  ;;  %v4219_v52 = vld [vmem:[%s5502_s19 + $0x48] ss:$28 sps:$4 sm:$0xff]  }
 0x783   : > { %2838 = vmatprep.subr.bf16.mxu1 %v4181_v53  ;;  %v4225_v53 = vld [vmem:[%s5502_s19 + $0x84] ss:$28 sps:$4 sm:$0xff]  }
 0x786   : > { %2839 = vmatpush1.bf16.msra.mxu1 %v4179_v54  ;;  %v4226_v54 = vld [vmem:[%s5502_s19 + $0x88] ss:$28 sps:$4 sm:$0xff]  }
 0x787   : > { %2840 = vmatprep.subr.bf16.mxu1 %v4187_v55  ;;  %v4223_v55 = vld [vmem:[%s5502_s19 + $0x80] ss:$28 sps:$4 sm:$0xff]  }
 0x78a   : > { %2841 = vmatpush1.bf16.msra.mxu1 %v4185_v56  ;;  %v4229_v56 = vld [vmem:[%s5502_s19 + $0xbc] ss:$28 sps:$4 sm:$0xff]  }
 0x78b   : > { %2842 = vmatprep.subr.bf16.mxu1 %v4193_v57  ;;  %v4230_v57 = vld [vmem:[%s5502_s19 + $0xc0] ss:$28 sps:$4 sm:$0xff]  }
 0x78e   : > { %2843 = vmatpush1.bf16.msra.mxu1 %v4191_v58  ;;  %v4227_v58 = vld [vmem:[%s5502_s19 + $0xb8] ss:$28 sps:$4 sm:$0xff]  }
 0x78f   : > { %2844 = vmatprep.subr.bf16.mxu1 %v4199_v59  ;;  %v4233_v59 = vld [vmem:[%s5502_s19 + $0xf4] ss:$28 sps:$4 sm:$0xff]  }
 0x792   : > { %2845 = vmatpush1.bf16.msra.mxu1 %v4197_v60  ;;  %v4234_v60 = vld [vmem:[%s5502_s19 + $0xf8] ss:$28 sps:$4 sm:$0xff]  }
 0x793   : > { %2846 = vmatprep.subr.bf16.mxu1 %v4205_v23 }
 0x796   : > { %2847 = vmatpush1.bf16.msra.mxu1 %v4203_v25 }
 0x797   : > { %2848 = vmatprep.subr.bf16.mxu1 %v4211_v27 }
 0x79a   : > { %2849 = vmatpush1.bf16.msra.mxu1 %v4209_v29 }
 0x79b   : > { %2940 = vmatprep.subr.bf16.mxu1 %v4217_v31 }
 0x850   : > { %v3874_v62 = vpop.f32.mrb[24].mxu1 }
 0x851   : > { %v2307_v63 = vadd.f32 %v3874_v62, %v3442_v61  ;;  %v2298_v0 = vpop.f32.mrb[25].mxu1  ;;  %v4237_v62 = vld [vmem:[%s5502_s19 + $0x12c] ss:$28 sps:$4 sm:$0xff]  }
 0x852   : > { %v2299_v1 = vadd.f32 %v3442_v61, %v2298_v0  ;;  %v3875_v2 = vpop.f32.mrb[26].mxu1  ;;  %v4235_v0 = vld [vmem:[%s5502_s19 + $0x128] ss:$28 sps:$4 sm:$0xff]  }
 0x853   : > { %v2310_v3 = vadd.f32 %v3875_v2, %v3442_v61  ;;  %v2301_v4 = vpop.f32.mrb[27].mxu1  ;;  %v2315_v6 = vmax.f32 %v2307_v63, 0.0  ;;  %v4238_v63 = vld [vmem:[%s5502_s19 + $0x130] ss:$28 sps:$4 sm:$0xff]   ;;  %v4242_v2 = vld [vmem:[%s5502_s19 + $0x168] ss:$28 sps:$4 sm:$0xff]  }
 0x854   : > { %v2302_v5 = vadd.f32 %v3442_v61, %v2301_v4  ;;  %v2313_v8 = vmax.f32 %v2299_v1, 0.0  ;;  %v4231_v61 = vld [vmem:[%s5502_s19 + $0xf0] ss:$28 sps:$4 sm:$0xff]   ;;  %v4241_v1 = vld [vmem:[%s5502_s19 + $0x164] ss:$28 sps:$4 sm:$0xff]  }
 0x855   : > { %v2316_v7 = vmax.f32 %v2310_v3, 0.0  ;;  %v4239_v3 = vld [vmem:[%s5502_s19 + $0x160] ss:$28 sps:$4 sm:$0xff]  }
 0x856   : > { %v2314_v9 = vmax.f32 %v2302_v5, 0.0  ;;  %v4245_v4 = vld [vmem:[%s5502_s19 + $0x19c] ss:$28 sps:$4 sm:$0xff]  }
 0x857   : > { %v2318_v10 = vpack.c.bf16 %v2316_v7, %v2315_v6  ;;  %v4246_v5 = vld [vmem:[%s5502_s19 + $0x1a0] ss:$28 sps:$4 sm:$0xff]   ;;  %v4243_v6 = vld [vmem:[%s5502_s19 + $0x198] ss:$28 sps:$4 sm:$0xff]   ;;  %v2511_v7 = vlaneseq }
 0x858   : > { %v2317_v11 = vpack.c.bf16 %v2314_v9, %v2313_v8 }
 0x859   : > { %v5385_v8 = vshrl.u32 %v2511_v7, 7 }
 0x85a   : > { %3892 = vmatprep.mubr.bf16.mxu0 %v2317_v11  ;;  %v5392_v11 = vld [vmem:[%s5576_s18] sm:$0x7f] }
 0x85b   : > { %3893 = vmatmul.mubr.bf16.vlgmr.msra.gmra.mrb[28].mxu0 %v2318_v10  ;;  %v2513_v9 = vsub.s32 0, %v5385_v8  ;;  %v2521_v10 = vsub.s32 2, %v5385_v8 }
 0x85c   : > { %2888 = vmatpush1.bf16.msra.mxu0 %v4170_v12  ;;  %2919 = vmatprep.mubr.bf16.mxu0 %v4594_v32  ;;  %v2517_v12 = vsub.s32 1, %v5385_v8 }
 0x85d   : > { %2889 = vmatprep.subr.bf16.mxu0 %v4178_v13  ;;  %v2525_v13 = vsub.s32 3, %v5385_v8 }
 0x860   : > { %2890 = vmatpush1.bf16.msra.mxu0 %v4176_v14  ;;  %v2514_v14 = vrot.slane %v5392_v11, %v2513_v9 }
 0x861   : > { %2891 = vmatprep.subr.bf16.mxu0 %v4184_v15  ;;  %v2522_v15 = vrot.slane %v5392_v11, %v2521_v10 }
 0x864   : > { %2892 = vmatpush1.bf16.msra.mxu0 %v4182_v16  ;;  %v2518_v16 = vrot.slane %v5392_v11, %v2517_v12 }
 0x865   : > { %2893 = vmatprep.subr.bf16.mxu0 %v4190_v17  ;;  %v2526_v17 = vrot.slane %v5392_v11, %v2525_v13 }
 0x868   : > { %2894 = vmatpush1.bf16.msra.mxu0 %v4188_v18 }
 0x869   : > { %2895 = vmatprep.subr.bf16.mxu0 %v4196_v19 }
 0x86c   : > { %2896 = vmatpush1.bf16.msra.mxu0 %v4194_v20 }
 0x86d   : > { %2897 = vmatprep.subr.bf16.mxu0 %v4202_v21 }
 0x870   : > { %2898 = vmatpush1.bf16.msra.mxu0 %v4200_v22 }
 0x871   : > { %2899 = vmatprep.subr.bf16.mxu0 %v4208_v24 }
 0x874   : > { %2900 = vmatpush1.bf16.msra.mxu0 %v4206_v26 }
 0x875   : > { %2901 = vmatprep.subr.bf16.mxu0 %v4214_v28 }
 0x878   : > { %2902 = vmatpush1.bf16.msra.mxu0 %v4212_v30 }
 0x879   : > { %3896 = vmatprep.subr.bf16.mxu0 %v4218_v33 }
 0x92e   : > { %v3894_v35 = vpop.f32.mrb[28].mxu0 }
 0x92f   : > { %v2433_v36 = vadd.f32 %v3894_v35, %v3451_v34  ;;  %v2424_v37 = vpop.f32.mrb[29].mxu0 }
 0x930   : > { %v2425_v38 = vadd.f32 %v3451_v34, %v2424_v37  ;;  %v3895_v39 = vpop.f32.mrb[30].mxu0 }
 0x931   : > { %v2436_v40 = vadd.f32 %v3895_v39, %v3451_v34  ;;  %v2427_v41 = vpop.f32.mrb[31].mxu0  ;;  %v2441_v43 = vmax.f32 %v2433_v36, 0.0 }
 0x932   : > { %v2428_v42 = vadd.f32 %v3451_v34, %v2427_v41  ;;  %v2439_v45 = vmax.f32 %v2425_v38, 0.0 }
 0x933   : > { %v2442_v44 = vmax.f32 %v2436_v40, 0.0 }
 0x934   : > { %v2440_v46 = vmax.f32 %v2428_v42, 0.0 }
 0x935   : > { %v5309_v47 = vpack.c.bf16 %v2442_v44, %v2441_v43 }
 0x936   : > { %v2443_v49 = vpack.c.bf16 %v2440_v46, %v2439_v45 }
 0x938   : > { %2867 = vmatmul.mubr.bf16.vlgmr.msra.gmra.mrb[28].mxu1 %v2443_v49  ;;  %2920 = vmatmul.mubr.bf16.vlgmr.msra.gmra.mrb[32].mxu0 %v2443_v49 }
 0x939   : > { %2941 = vmatpush1.bf16.msra.mxu1 %v4215_v48  ;;  %3897 = vmatpush3.bf16.msra.mxu0 %v4218_v33 }
 0x93a   : > { %2942 = vmatprep.subr.bf16.mxu1 %v4221_v50  ;;  %3898 = vmatprep.subr.bf16.mxu0 %v4222_v51 }
 0x93b   : > { %2876 = vmatprep.mubr.bf16.mxu1 %v4594_v32  ;;  %2929 = vmatprep.mubr.bf16.mxu0 %v4594_v32 }
 0x93d   : > { %2943 = vmatpush1.bf16.msra.mxu1 %v4219_v52  ;;  %3899 = vmatpush3.bf16.msra.mxu0 %v4222_v51 }
 0x93e   : > { %2944 = vmatprep.subr.bf16.mxu1 %v4225_v53  ;;  %3900 = vmatprep.subr.bf16.mxu0 %v4226_v54 }
 0x940   : > { %2877 = vmatmul.mubr.bf16.gmra.mrb[32].mxu1 %v5309_v47  ;;  %2930 = vmatmul.mubr.bf16.gmra.mrb[36].mxu0 %v5309_v47 }
 0x941   : > { %2945 = vmatpush1.bf16.msra.mxu1 %v4223_v55  ;;  %3901 = vmatpush3.bf16.msra.mxu0 %v4226_v54 }
 0x942   : > { %3912 = vmatprep.mubr.bf16.mxu0 %v2443_v49  ;;  %2946 = vmatprep.subr.bf16.mxu1 %v4229_v56 }
 0x943   : > { %3902 = vmatprep.subr.bf16.mxu0 %v4230_v57  ;;  %2972 = vmatprep.mubr.bf16.mxu1 %v4594_v32 }
 0x945   : > { %2947 = vmatpush1.bf16.msra.mxu1 %v4227_v58  ;;  %3903 = vmatpush3.bf16.msra.mxu0 %v4230_v57  ;;  %v2529_v58 = vsub.s32 4, %v5385_v8 }
 0x946   : > { %2948 = vmatprep.subr.bf16.mxu1 %v4233_v59  ;;  %3904 = vmatprep.subr.bf16.mxu0 %v4234_v60  ;;  %v2537_v59 = vsub.s32 6, %v5385_v8 }
 0x949   : > { %2949 = vmatpush1.bf16.msra.mxu1 %v4231_v61  ;;  %3905 = vmatpush3.bf16.msra.mxu0 %v4234_v60  ;;  %v2533_v60 = vsub.s32 5, %v5385_v8  ;;  %v2530_v61 = vrot.slane %v5392_v11, %v2529_v58 }
 0x94a   : > { %2950 = vmatprep.subr.bf16.mxu1 %v4237_v62  ;;  %3906 = vmatprep.subr.bf16.mxu0 %v4238_v63  ;;  %v2538_v62 = vrot.slane %v5392_v11, %v2537_v59 }
 0x94d   : > { %2951 = vmatpush1.bf16.msra.mxu1 %v4235_v0  ;;  %3907 = vmatpush3.bf16.msra.mxu0 %v4238_v63  ;;  %v2534_v63 = vrot.slane %v5392_v11, %v2533_v60 }
 0x94e   : > { %2952 = vmatprep.subr.bf16.mxu1 %v4241_v1  ;;  %3908 = vmatprep.subr.bf16.mxu0 %v4242_v2 }
 0x951   : > { %2953 = vmatpush1.bf16.msra.mxu1 %v4239_v3  ;;  %3909 = vmatpush3.bf16.msra.mxu0 %v4242_v2 }
 0x952   : > { %2954 = vmatprep.subr.bf16.mxu1 %v4245_v4  ;;  %3910 = vmatprep.subr.bf16.mxu0 %v4246_v5 }
 0x955   : > { %2955 = vmatpush1.bf16.msra.mxu1 %v4243_v6  ;;  %3911 = vmatpush3.bf16.msra.mxu0 %v4246_v5 }
 0x958   : > { %2973 = vmatmul.mubr.bf16.vlgmr.msra.gmra.mrb[36].mxu1 %v2443_v49  ;;  %3913 = vmatmul.mubr.bf16.vlgmr.msra.gmra.mrb[40].mxu0 %v5309_v47 }
 0x959   : > { %2982 = vmatprep.mubr.bf16.mxu1 %v4594_v32 }
 0x960   : > { %2983 = vmatmul.mubr.bf16.gmra.mrb[40].mxu1 %v5309_v47 }
 0xa0b   : > { %v2868_v18 = vpop.f32.mrb[28].mxu1  ;;  %v2921_v19 = vpop.f32.mrb[32].mxu0 }
 0xa0c   : > { %v2869_v20 = vadd.f32 %v2868_v18, %v2514_v14  ;;  %v2922_v21 = vadd.f32 %v2921_v19, %v2522_v15  ;;  %v2870_v22 = vpop.f32.mrb[29].mxu1  ;;  %v2923_v23 = vpop.f32.mrb[33].mxu0 }
 0xa0d   : > { %v2871_v24 = vadd.f32 %v2870_v22, %v2518_v16  ;;  %v2924_v25 = vadd.f32 %v2923_v23, %v2526_v17  ;;  %v2872_v26 = vpop.f32.mrb[30].mxu1  ;;  %v2925_v27 = vpop.f32.mrb[34].mxu0 }
 0xa0e   : > { %v2873_v28 = vadd.f32 %v2872_v26, %v2514_v14  ;;  %v2926_v29 = vadd.f32 %v2925_v27, %v2522_v15  ;;  %v2874_v30 = vpop.f32.mrb[31].mxu1  ;;  %v2927_v31 = vpop.f32.mrb[35].mxu0 }
 0xa0f   : > { %v3537_v32 = vpack.c.bf16 %v2871_v24, %v2869_v20  ;;  %v3538_v33 = vpack.c.bf16 %v2924_v25, %v2922_v21  ;;  %v2875_v34 = vadd.f32 %v2874_v30, %v2518_v16  ;;  %v2928_v35 = vadd.f32 %v2927_v31, %v2526_v17 }
 0xa11   : > { %3130 = vst [vmem:[%s5403_s7] sm:$0xff] %v3537_v32  ;;  %3131 = vst [vmem:[%s5403_s7 + $0x8] sm:$0xff] %v3538_v33  ;;  %v3541_v36 = vpack.c.bf16 %v2875_v34, %v2873_v28  ;;  %v3542_v37 = vpack.c.bf16 %v2928_v35, %v2926_v29 }
 0xa13   : > { %3135 = vst [vmem:[%s5403_s7 + $0x1c] sm:$0xff] %v3541_v36  ;;  %3136 = vst [vmem:[%s5403_s7 + $0x24] sm:$0xff] %v3542_v37  ;;  %v2878_v38 = vpop.f32.mrb[32].mxu1  ;;  %v2931_v39 = vpop.f32.mrb[36].mxu0 }
 0xa14   : > { %v2879_v40 = vadd.f32 %v2878_v38, %v2514_v14  ;;  %v2932_v41 = vadd.f32 %v2931_v39, %v2522_v15  ;;  %v2880_v42 = vpop.f32.mrb[33].mxu1  ;;  %v2933_v43 = vpop.f32.mrb[37].mxu0 }
 0xa15   : > { %v2881_v44 = vadd.f32 %v2880_v42, %v2518_v16  ;;  %v2934_v45 = vadd.f32 %v2933_v43, %v2526_v17  ;;  %v2882_v46 = vpop.f32.mrb[34].mxu1  ;;  %v2935_v47 = vpop.f32.mrb[38].mxu0 }
 0xa16   : > { %v2883_v48 = vadd.f32 %v2882_v46, %v2514_v14  ;;  %v2936_v49 = vadd.f32 %v2935_v47, %v2522_v15  ;;  %v2884_v50 = vpop.f32.mrb[35].mxu1  ;;  %v2937_v51 = vpop.f32.mrb[39].mxu0 }
 0xa17   : > { %v3545_v52 = vpack.c.bf16 %v2881_v44, %v2879_v40  ;;  %v3546_v53 = vpack.c.bf16 %v2934_v45, %v2932_v41  ;;  %v2885_v54 = vadd.f32 %v2884_v50, %v2518_v16  ;;  %v2938_v55 = vadd.f32 %v2937_v51, %v2526_v17 }
 0xa19   : > { %3139 = vst [vmem:[%s5403_s7 + $0x38] sm:$0xff] %v3545_v52  ;;  %3140 = vst [vmem:[%s5403_s7 + $0x40] sm:$0xff] %v3546_v53  ;;  %v3549_v56 = vpack.c.bf16 %v2885_v54, %v2883_v48  ;;  %v3550_v57 = vpack.c.bf16 %v2938_v55, %v2936_v49 }
 0xa1b   : > { %3143 = vst [vmem:[%s5403_s7 + $0x54] sm:$0xff] %v3549_v56  ;;  %3144 = vst [vmem:[%s5403_s7 + $0x5c] sm:$0xff] %v3550_v57 }
 0xa2b   : > { %v2974_v0 = vpop.f32.mrb[36].mxu1  ;;  %v3914_v1 = vpop.f32.mrb[40].mxu0 }
 0xa2c   : > { %v2975_v2 = vadd.f32 %v2974_v0, %v2530_v61  ;;  %v3036_v3 = vadd.f32 %v3914_v1, %v2538_v62  ;;  %v2976_v4 = vpop.f32.mrb[37].mxu1  ;;  %v3027_v5 = vpop.f32.mrb[41].mxu0 }
 0xa2d   : > { %v2977_v6 = vadd.f32 %v2976_v4, %v2534_v63  ;;  %v3028_v7 = vadd.f32 %v3027_v5, %v2538_v62  ;;  %v2978_v9 = vpop.f32.mrb[38].mxu1  ;;  %v3915_v8 = vpop.f32.mrb[42].mxu0 }
 0xa2e   : > { %v3548_v10 = vpack.c.bf16 %v3036_v3, %v3036_v3  ;;  %v2979_v12 = vadd.f32 %v2978_v9, %v2530_v61  ;;  %v3039_v11 = vadd.f32 %v3915_v8, %v2538_v62  ;;  %v2980_v13 = vpop.f32.mrb[39].mxu1  ;;  %v3030_v14 = vpop.f32.mrb[43].mxu0 }
 0xa2f   : > { %v3539_v15 = vpack.c.bf16 %v2977_v6, %v2975_v2  ;;  %v3540_v16 = vpack.c.bf16 %v3028_v7, %v3028_v7  ;;  %v2981_v17 = vadd.f32 %v2980_v13, %v2534_v63  ;;  %v3031_v18 = vadd.f32 %v3030_v14, %v2538_v62 }
 0xa30   : > { %3142 = vst.msk [vmem:[%s5403_s7 + $0x50] sm:$0xf] %vm3133_vm1, %v3548_v10  ;;  %v3552_v19 = vpack.c.bf16 %v3039_v11, %v3039_v11 }
 0xa31   : > { %3132 = vst [vmem:[%s5403_s7 + $0x10] sm:$0xff] %v3539_v15  ;;  %3134 = vst.msk [vmem:[%s5403_s7 + $0x18] sm:$0xf] %vm3133_vm1, %v3540_v16  ;;  %v3543_v20 = vpack.c.bf16 %v2981_v17, %v2979_v12  ;;  %v3544_v21 = vpack.c.bf16 %v3031_v18, %v3031_v18 }
 0xa32   : > { %3146 = vst.msk [vmem:[%s5403_s7 + $0x6c] sm:$0xf] %vm3133_vm1, %v3552_v19 }
 0xa33   : > { %3137 = vst [vmem:[%s5403_s7 + $0x2c] sm:$0xff] %v3543_v20  ;;  %3138 = vst.msk [vmem:[%s5403_s7 + $0x34] sm:$0xf] %vm3133_vm1, %v3544_v21  ;;  %v2984_v22 = vpop.f32.mrb[40].mxu1 }
 0xa34   : > { %v2985_v23 = vadd.f32 %v2984_v22, %v2530_v61  ;;  %v2986_v24 = vpop.f32.mrb[41].mxu1 }
 0xa35   : > { %v2987_v25 = vadd.f32 %v2986_v24, %v2534_v63  ;;  %v2988_v26 = vpop.f32.mrb[42].mxu1 }
 0xa36   : > { %v2989_v27 = vadd.f32 %v2988_v26, %v2530_v61  ;;  %v2990_v28 = vpop.f32.mrb[43].mxu1 }
 0xa37   : > { %v3547_v29 = vpack.c.bf16 %v2987_v25, %v2985_v23  ;;  %v2991_v30 = vadd.f32 %v2990_v28, %v2534_v63 }
 0xa39   : > { %3141 = vst [vmem:[%s5403_s7 + $0x48] sm:$0xff] %v3547_v29  ;;  %v3551_v31 = vpack.c.bf16 %v2991_v30, %v2989_v27 }
 0xa3b   : > { %3145 = vst [vmem:[%s5403_s7 + $0x64] sm:$0xff] %v3551_v31 }
 0xa3c   : > { %4512 = shalt.err (!%p4509_p4)
}
 0xa3d   : > { %s4513_s5 = scalar_lea.hbm %s5434_s29, 1792  ;;  %s4517_s26 = scalar_lea.hbm %s5578_s20, 3584 }
 0xa3e   : > { %p4514_p12 = scmp.ne.s32.totalorder %s5434_s29, %s4513_s5  ;;  %p4518_p11 = scmp.lt.u32.totalorder %s5434_s29, %s5578_s20 }
 0xa3f   : > { %p4519_p13 = scmp.lt.u32.totalorder %s4517_s26, %s4513_s5  ;;  %p4521_p6 = scmp.lt.u32.totalorder %s4513_s5, %s5434_s29 }
 0xa40   : > { %p4515_p7 = pnand %p4514_p12, %p5579_p9 }
 0xa41   : > { %p4520_p1 = por %p4519_p13, %p4518_p11 }
 0xa42   : > { %p4516_p8 = pneg %p4515_p7 }
 0xa43   : > { %p4522_p5 = por %p4521_p6, %p4520_p1 }
 0xa45   : > { %p4523_p0 = pnand %p4522_p5, %p4516_p8 }
 0xa47   : > { %4526 = shalt.err (!%p4523_p0)
}
 0xa48   : > { %s4596_s4 = smov 448   ;;  %s4597_s24 = smov 28  }
 0xa49   : > { %3955 = dma.vmem_to_hbm [thread:$0]  (%p5579_p9), %s5436_s0, 1792, %s5434_s29, %s5442_s3, %s4596_s4, %s4596_s4, %s4597_s24  }
 0xa4a PF: > { %s5580_s1 = sld [smem:[#allocation27_spill]]  ;;  %s5581_s25 = sld [smem:[#allocation24_spill]] }
 0xa4b   : > { %s5582_s21 = sld [smem:[#allocation31_spill]] }
 0xa50   : > { %p4007_p10 = scmp.ge.s32.totalorder %s5580_s1, 2  ;;  %s3177_s30 = sand.u32 1, %s5581_s25  }
 0xa51   : > { %p5583_p2 = scmp.ne.s32.totalorder %s5582_s21, 0  ;;  %s3178_s23 = scalar_lea.sflag [#allocation4], %s3177_s30 }
 0xa53   : > { %p3986_p3 = pnand %p4007_p10, %p5583_p2 }
 0xa55   : > { %4564 = dma.done.wait (!%p3986_p3), %s3178_s23, 1792  }
 0xa56   : > { %4566 = vsyncadd (!%p3986_p3), %s3178_s23, 4294965504  ;;  %s5584_s27 = sld [smem:[#allocation28_spill]]  ;;  %s5585_s2 = sld [smem:[#allocation25_spill]] }
 0xa57   : > { %s5586_s25 = sld [smem:[#allocation26_spill]]  ;;  %s5587_s26 = sld [smem:[#allocation29_spill]] }
 0xa5c   : > { %p36_p4 = scmp.ge.s32.totalorder %s5584_s27, 4  }
 0xa5e   :  { %38 = sbr.rel (!%p36_p4) target bundleno = 20 (0x14), region = 176 }
 0xa65   :  { %3183 = vsyncpa [#allocation3], 1 }
 0xa66   :  { %3185 = vsyncpa [#allocation3 + $0x1], 1 }
 0xa67   :  { %3186 = vsyncpa [#allocation6], 1 }
 0xa68   :  { %3187 = vsyncpa [#allocation9], 1 }
 0xa69   :  { %3188 = vsyncpa [#allocation12], 1 }
 0xa6a   :  { %3189 = vsyncpa [#allocation15], 1 }
 0xa6b   :  { %3190 = vsyncpa [#allocation4], 1 }
 0xa6c   :  { %3192 = vsyncpa [#allocation4 + $0x1], 1 }

</bundles_post_ra>
